<compile_context>
chip_gen: v7x
topology: tpu7x:2x2x1
jax: 0.10.0
libtpu: 0.0.40
codegen_flags: <defaults>
</compile_context>

<pallas_src>
import functools
import math

import numpy as np
import jax
import jax.numpy as jnp
from jax.experimental import pallas as pl
from jax.experimental.pallas import tpu as pltpu


# ------------------------------- kernel --------------------------------------

def sab_kernel(lens_ref, x_ref,
               gin_ref, bin_ref, wq_ref, wkv_ref, wo_ref,
               gi2_ref, bi2_ref, wf1_ref, bf1_ref, wf2_ref, bf2_ref,
               o_ref, *, num_heads, d_head):
    """One padded set (block (1, L, D)) of SetAttentionBlock.forward."""
    eps = 1e-5
    L = x_ref.shape[1]
    hd = num_heads * d_head
    n = lens_ref[pl.program_id(0)]                        # valid rows of this set

    def layer_norm(v, g, b):
        mu = jnp.mean(v, axis=-1, keepdims=True)
        var = jnp.mean(jnp.square(v - mu), axis=-1, keepdims=True)
        return (v - mu) * jax.lax.rsqrt(var + eps) * g + b

    x = x_ref[0]                                          # (L, D)

    # --- projections: Q from norm_in(x); K,V fused, from raw x (mem = x) -----
    xq = layer_norm(x, gin_ref[...], bin_ref[...])
    q = jnp.dot(xq, wq_ref[...], preferred_element_type=jnp.float32)    # (L, hd)
    kv = jnp.dot(x, wkv_ref[...], preferred_element_type=jnp.float32)   # (L, 2hd)
    k = kv[:, :hd]
    v = kv[:, hd:]

    # --- all-head scores with ONE full-width contraction ---------------------
    # head selector: sel[i, c] = 1.0 iff column c belongs to head i
    hrow = jax.lax.broadcasted_iota(jnp.int32, (num_heads, hd), 0)
    col = jax.lax.broadcasted_iota(jnp.int32, (num_heads, hd), 1)
    sel = jnp.where((col >= hrow * d_head) & (col < (hrow + 1) * d_head),
                    1.0, 0.0)                                           # (h, hd)

    # block-diagonal expansion of Q: row (i*L + x) keeps only head-i columns,
    # so (h*L, hd) @ (L, hd)^T yields every head's (L, L) score block at once.
    qb = (q[None, :, :] * sel[:, None, :]).reshape(num_heads * L, hd)
    e = jax.lax.dot_general(qb, k, (((1,), (1,)), ((), ())),
                            preferred_element_type=jnp.float32)          # (h*L, L)
    e = e * (1.0 / math.sqrt(d_head))

    # validity mask built in-kernel from the scalar-prefetched length
    rows = jax.lax.broadcasted_iota(jnp.int32, (L, L), 0)
    cols = jax.lax.broadcasted_iota(jnp.int32, (L, L), 1)
    maskf = jnp.where((rows < n) & (cols < n), 1.0, 0.0)                  # (L, L)
    maskr = jnp.broadcast_to(maskf[None], (num_heads, L, L)) \
               .reshape(num_heads * L, L)

    e = jnp.where(maskr > 0.5, e, jnp.float32(-1e30))     # masked_fill(-inf)
    p = jnp.exp(e - jnp.max(e, axis=-1, keepdims=True))
    inv = pl.reciprocal(jnp.sum(p, axis=-1, keepdims=True), approx=True)
    alpha = p * inv * maskr                               # masked_fill(0.0)

    # alpha @ V for all heads at once, then fold head blocks back to (L, hd)
    ob = jnp.dot(alpha, v, preferred_element_type=jnp.float32)            # (h*L, hd)
    oh = jnp.sum(ob.reshape(num_heads, L, hd) * sel[:, None, :], axis=0)  # (L, hd)
    attn = jnp.dot(oh, wo_ref[...], preferred_element_type=jnp.float32)   # (L, D)

    # --- residual + FFN -------------------------------------------------------
    x1 = x + attn
    xi = layer_norm(x1, gi2_ref[...], bi2_ref[...])
    h1 = jnp.maximum(
        jnp.dot(xi, wf1_ref[...], preferred_element_type=jnp.float32) + bf1_ref[...],
        0.0)
    ff = jnp.dot(h1, wf2_ref[...], preferred_element_type=jnp.float32) + bf2_ref[...]
    o_ref[0] = x1 + ff


# ------------------------------- wrapper --------------------------------------

def set_attention_block(feat, lengths, params, *, num_heads, d_head):
    """SetAttentionBlock.forward(feat, lengths); feat is packed (sum(lengths), D)."""
    N, D = feat.shape
    B = len(lengths)
    L = max(int(l) for l in lengths)
    L = ((L + 7) // 8) * 8                                # sublane-friendly pad
    d_ff = params['wf1'].shape[1]
    hd = num_heads * d_head

    # glue: packed -> zero-padded (B, L, D) with a single gather
    offs = np.concatenate([[0], np.cumsum(lengths)[:-1]]).astype(np.int64)
    gidx = np.zeros((B, L), np.int32)
    vmask = np.zeros((B, L, 1), np.float32)
    for b, (o, nb) in enumerate(zip(offs, lengths)):
        gidx[b, :nb] = o + np.arange(nb)
        vmask[b, :nb, 0] = 1.0
    x_pad = feat[jnp.asarray(gidx)] * jnp.asarray(vmask)

    lens = jnp.asarray(lengths, jnp.int32)

    def _const(shape):
        zeros = (0,) * len(shape)
        return pl.BlockSpec(shape, lambda b, lens_ref, zeros=zeros: zeros)

    grid_spec = pltpu.PrefetchScalarGridSpec(
        num_scalar_prefetch=1,
        grid=(B,),
        in_specs=[
            pl.BlockSpec((1, L, D), lambda b, lens_ref: (b, 0, 0)),   # x (per set)
            _const((1, D)), _const((1, D)),                           # norm_in g/b
            _const((D, hd)),                                          # W_q
            _const((D, 2 * hd)),                                      # [W_k | W_v]
            _const((hd, D)),                                          # W_o
            _const((1, D)), _const((1, D)),                           # norm_inter g/b
            _const((D, d_ff)), _const((1, d_ff)),                     # FFN linear 1
            _const((d_ff, D)), _const((1, D)),                        # FFN linear 2
        ],
        out_specs=pl.BlockSpec((1, L, D), lambda b, lens_ref: (b, 0, 0)),
    )

    kernel = functools.partial(sab_kernel, num_heads=num_heads, d_head=d_head)
    y_pad = pl.pallas_call(
        kernel,
        grid_spec=grid_spec,
        out_shape=jax.ShapeDtypeStruct((B, L, D), jnp.float32),
        compiler_params=pltpu.CompilerParams(
            dimension_semantics=("parallel",)),   # v7x: 2 TCs split the sets
    )(lens, x_pad,
      params['gin'], params['bin'], params['wq'], params['wkv'], params['wo'],
      params['gi2'], params['bi2'], params['wf1'], params['bf1'],
      params['wf2'], params['bf2'])

    # glue: padded -> packed with a single gather
    flat_idx = np.concatenate(
        [b * L + np.arange(nb) for b, nb in enumerate(lengths)]).astype(np.int32)
    return y_pad.reshape(B * L, D)[jnp.asarray(flat_idx)]


# --------------------------- params & reference --------------------------------

def init_params(key, *, d_model, num_heads, d_head, d_ff):
    hd = num_heads * d_head
    ks = list(jax.random.split(key, 8))

    def xavier(k, shape):
        lim = math.sqrt(6.0 / (shape[0] + shape[1]))
        return jax.random.uniform(k, shape, jnp.float32, -lim, lim)

    return {
        'gin': jnp.ones((1, d_model), jnp.float32),
        'bin': jnp.zeros((1, d_model), jnp.float32),
        'wq': xavier(ks[0], (d_model, hd)),
        'wkv': jnp.concatenate([xavier(ks[1], (d_model, hd)),
                                xavier(ks[2], (d_model, hd))], axis=1),
        'wo': xavier(ks[3], (hd, d_model)),
        'gi2': jnp.ones((1, d_model), jnp.float32),
        'bi2': jnp.zeros((1, d_model), jnp.float32),
        'wf1': xavier(ks[4], (d_model, d_ff)),
        'bf1': (0.01 * jax.random.normal(ks[5], (1, d_ff))).astype(jnp.float32),
        'wf2': xavier(ks[6], (d_ff, d_model)),
        'bf2': (0.01 * jax.random.normal(ks[7], (1, d_model))).astype(jnp.float32),
    }


def sab_reference(feat, lengths, params, *, num_heads, d_head):
    """Pure-JAX replica of SetAttentionBlock.forward (eval mode, dropout = 0)."""
    eps = 1e-5
    hd = num_heads * d_head

    def ln(v, g, b):
        mu = v.mean(-1, keepdims=True)
        var = ((v - mu) ** 2).mean(-1, keepdims=True)
        return (v - mu) / jnp.sqrt(var + eps) * g + b

    x = feat
    q = ln(x, params['gin'][0], params['bin'][0]) @ params['wq']
    kv = x @ params['wkv']
    k, v = kv[:, :hd], kv[:, hd:]
    outs, off = [], 0
    for nb in lengths:
        qs = q[off:off + nb].reshape(nb, num_heads, d_head)
        ks = k[off:off + nb].reshape(nb, num_heads, d_head)
        vs = v[off:off + nb].reshape(nb, num_heads, d_head)
        e = jnp.einsum('xhd,yhd->hxy', qs, ks) / np.sqrt(d_head)
        a = jax.nn.softmax(e, axis=-1)
        o = jnp.einsum('hxy,yhd->xhd', a, vs).reshape(nb, hd)
        outs.append(o @ params['wo'])
        off += nb
    x = x + jnp.concatenate(outs, axis=0)
    xi = ln(x, params['gi2'][0], params['bi2'][0])
    h1 = jax.nn.relu(xi @ params['wf1'] + params['bf1'][0])
    return x + h1 @ params['wf2'] + params['bf2'][0]


# ----------------------------------- main --------------------------------------

if __name__ == "__main__":
    d_model = 128
    num_heads = 4
    d_head = 32            # num_heads * d_head == d_model (lane-dense, 128)
    d_ff = 256
    lengths = [8, 5, 3]    # three sets (molecules) packed together
    N = sum(lengths)

    key = jax.random.PRNGKey(0)
    k_feat, k_par = jax.random.split(key)
    feat = jax.random.normal(k_feat, (N, d_model), jnp.float32)
    params = init_params(k_par, d_model=d_model, num_heads=num_heads,
                         d_head=d_head, d_ff=d_ff)

    out = set_attention_block(feat, lengths, params,
                              num_heads=num_heads, d_head=d_head)
    out = jax.block_until_ready(out)

    with jax.default_matmul_precision("highest"):
        ref = jax.block_until_ready(
            sab_reference(feat, lengths, params,
                          num_heads=num_heads, d_head=d_head))

    assert out.shape == (N, d_model)
    assert bool(jnp.all(jnp.isfinite(out)))
    assert bool(jnp.allclose(out, ref, rtol=2e-2, atol=2e-2)), \
        float(jnp.max(jnp.abs(out - ref)))
    print("KERNEL_OK")
</pallas_src>

<mosaic_0001>
module attributes {stable_mosaic.version = 11 : i64} {
  func.func @sab_kernel(%arg0: i32, %arg1: memref<3xi32, #tpu.memory_space<smem>>, %arg2: memref<1x8x128xf32, #tpu.memory_space<vmem>>, %arg3: memref<1x128xf32, #tpu.memory_space<vmem>>, %arg4: memref<1x128xf32, #tpu.memory_space<vmem>>, %arg5: memref<128x128xf32, #tpu.memory_space<vmem>>, %arg6: memref<128x256xf32, #tpu.memory_space<vmem>>, %arg7: memref<128x128xf32, #tpu.memory_space<vmem>>, %arg8: memref<1x128xf32, #tpu.memory_space<vmem>>, %arg9: memref<1x128xf32, #tpu.memory_space<vmem>>, %arg10: memref<128x256xf32, #tpu.memory_space<vmem>>, %arg11: memref<1x256xf32, #tpu.memory_space<vmem>>, %arg12: memref<256x128xf32, #tpu.memory_space<vmem>>, %arg13: memref<1x128xf32, #tpu.memory_space<vmem>>, %arg14: memref<1x8x128xf32, #tpu.memory_space<vmem>>) attributes {dimension_semantics = [#tpu.dimension_semantics<parallel>], iteration_bounds = array<i64: 3>, scalar_prefetch = 1 : i64, scratch_operands = 0 : i64, tpu.core_type = #tpu.core_type<tc>, window_params = [{transform_indices = @transform_0, window_bounds = array<i64: 1, 8, 128>}, {pipeline_mode = #tpu.pipeline_mode<synchronous>, transform_indices = @transform_1, window_bounds = array<i64: 1, 128>}, {pipeline_mode = #tpu.pipeline_mode<synchronous>, transform_indices = @transform_2, window_bounds = array<i64: 1, 128>}, {pipeline_mode = #tpu.pipeline_mode<synchronous>, transform_indices = @transform_3, window_bounds = array<i64: 128, 128>}, {pipeline_mode = #tpu.pipeline_mode<synchronous>, transform_indices = @transform_4, window_bounds = array<i64: 128, 256>}, {pipeline_mode = #tpu.pipeline_mode<synchronous>, transform_indices = @transform_5, window_bounds = array<i64: 128, 128>}, {pipeline_mode = #tpu.pipeline_mode<synchronous>, transform_indices = @transform_6, window_bounds = array<i64: 1, 128>}, {pipeline_mode = #tpu.pipeline_mode<synchronous>, transform_indices = @transform_7, window_bounds = array<i64: 1, 128>}, {pipeline_mode = #tpu.pipeline_mode<synchronous>, transform_indices = @transform_8, window_bounds = array<i64: 128, 256>}, {pipeline_mode = #tpu.pipeline_mode<synchronous>, transform_indices = @transform_9, window_bounds = array<i64: 1, 256>}, {pipeline_mode = #tpu.pipeline_mode<synchronous>, transform_indices = @transform_10, window_bounds = array<i64: 256, 128>}, {pipeline_mode = #tpu.pipeline_mode<synchronous>, transform_indices = @transform_11, window_bounds = array<i64: 1, 128>}, {transform_indices = @transform_12, window_bounds = array<i64: 1, 8, 128>}]} {
    %0 = arith.index_cast %arg0 : i32 to index
    %1 = memref.load %arg1[%0] : memref<3xi32, #tpu.memory_space<smem>>
    %c0 = arith.constant 0 : index
    %c0_0 = arith.constant 0 : index
    %c0_1 = arith.constant 0 : index
    %2 = vector.load %arg2[%c0, %c0_0, %c0_1] : memref<1x8x128xf32, #tpu.memory_space<vmem>>, vector<1x8x128xf32>
    %3 = vector.shape_cast %2 : vector<1x8x128xf32> to vector<8x128xf32>
    %c0_2 = arith.constant 0 : index
    %c0_3 = arith.constant 0 : index
    %4 = vector.load %arg3[%c0_2, %c0_3] : memref<1x128xf32, #tpu.memory_space<vmem>>, vector<1x128xf32>
    %c0_4 = arith.constant 0 : index
    %c0_5 = arith.constant 0 : index
    %5 = vector.load %arg4[%c0_4, %c0_5] : memref<1x128xf32, #tpu.memory_space<vmem>>, vector<1x128xf32>
    %cst = arith.constant dense<0.000000e+00> : vector<8xf32>
    %6 = vector.multi_reduction <add>, %3, %cst [1] : vector<8x128xf32> to vector<8xf32>
    %7 = vector.shape_cast %6 : vector<8xf32> to vector<8x1xf32>
    %cst_6 = arith.constant 1.280000e+02 : f32
    %8 = vector.broadcast %cst_6 : f32 to vector<8x1xf32>
    %9 = arith.divf %7, %8 : vector<8x1xf32>
    %10 = vector.broadcast %9 : vector<8x1xf32> to vector<8x128xf32>
    %11 = arith.subf %3, %10 : vector<8x128xf32>
    %12 = arith.mulf %11, %11 : vector<8x128xf32>
    %cst_7 = arith.constant dense<0.000000e+00> : vector<8xf32>
    %13 = vector.multi_reduction <add>, %12, %cst_7 [1] : vector<8x128xf32> to vector<8xf32>
    %14 = vector.shape_cast %13 : vector<8xf32> to vector<8x1xf32>
    %cst_8 = arith.constant 1.280000e+02 : f32
    %15 = vector.broadcast %cst_8 : f32 to vector<8x1xf32>
    %16 = arith.divf %14, %15 : vector<8x1xf32>
    %17 = vector.broadcast %9 : vector<8x1xf32> to vector<8x128xf32>
    %18 = arith.subf %3, %17 : vector<8x128xf32>
    %cst_9 = arith.constant 9.99999974E-6 : f32
    %19 = vector.broadcast %cst_9 : f32 to vector<8x1xf32>
    %20 = arith.addf %16, %19 : vector<8x1xf32>
    %21 = math.rsqrt %20 : vector<8x1xf32>
    %22 = vector.broadcast %21 : vector<8x1xf32> to vector<8x128xf32>
    %23 = arith.mulf %18, %22 : vector<8x128xf32>
    %24 = vector.broadcast %4 : vector<1x128xf32> to vector<8x128xf32>
    %25 = arith.mulf %23, %24 : vector<8x128xf32>
    %26 = vector.broadcast %5 : vector<1x128xf32> to vector<8x128xf32>
    %27 = arith.addf %25, %26 : vector<8x128xf32>
    %c0_10 = arith.constant 0 : index
    %c0_11 = arith.constant 0 : index
    %28 = vector.load %arg5[%c0_10, %c0_11] : memref<128x128xf32, #tpu.memory_space<vmem>>, vector<128x128xf32>
    %cst_12 = arith.constant dense<0.000000e+00> : vector<8x128xf32>
    %29 = tpu.matmul %27, %28, %cst_12 {dimension_numbers = #tpu.dot_dimension_numbers<[1], [0], [0], [1], [0, 0, 1, 1], [], []>} : vector<8x128xf32>, vector<128x128xf32>, vector<8x128xf32> -> vector<8x128xf32>
    %c0_13 = arith.constant 0 : index
    %c0_14 = arith.constant 0 : index
    %30 = vector.load %arg6[%c0_13, %c0_14] : memref<128x256xf32, #tpu.memory_space<vmem>>, vector<128x256xf32>
    %cst_15 = arith.constant dense<0.000000e+00> : vector<8x256xf32>
    %31 = tpu.matmul %3, %30, %cst_15 {dimension_numbers = #tpu.dot_dimension_numbers<[1], [0], [0], [1], [0, 0, 1, 1], [], []>} : vector<8x128xf32>, vector<128x256xf32>, vector<8x256xf32> -> vector<8x256xf32>
    %32 = vector.extract_strided_slice %31 {offsets = [0, 0], sizes = [8, 128], strides = [1, 1]} : vector<8x256xf32> to vector<8x128xf32>
    %33 = vector.extract_strided_slice %31 {offsets = [0, 128], sizes = [8, 128], strides = [1, 1]} : vector<8x256xf32> to vector<8x128xf32>
    %34 = tpu.iota {dimensions = array<i32: 0>} : vector<4x128xi32>
    %35 = tpu.iota {dimensions = array<i32: 1>} : vector<4x128xi32>
    %c32_i32 = arith.constant 32 : i32
    %36 = vector.broadcast %c32_i32 : i32 to vector<4x128xi32>
    %37 = arith.muli %34, %36 : vector<4x128xi32>
    %38 = arith.cmpi sge, %35, %37 : vector<4x128xi32>
    %c1_i32 = arith.constant 1 : i32
    %39 = vector.broadcast %c1_i32 : i32 to vector<4x128xi32>
    %40 = arith.addi %34, %39 : vector<4x128xi32>
    %c32_i32_16 = arith.constant 32 : i32
    %41 = vector.broadcast %c32_i32_16 : i32 to vector<4x128xi32>
    %42 = arith.muli %40, %41 : vector<4x128xi32>
    %43 = arith.cmpi slt, %35, %42 : vector<4x128xi32>
    %44 = arith.andi %38, %43 : vector<4x128xi1>
    %cst_17 = arith.constant 1.000000e+00 : f32
    %cst_18 = arith.constant 0.000000e+00 : f32
    %45 = vector.broadcast %cst_17 : f32 to vector<4x128xf32>
    %46 = vector.broadcast %cst_18 : f32 to vector<4x128xf32>
    %47 = arith.select %44, %45, %46 : vector<4x128xi1>, vector<4x128xf32>
    %48 = vector.shape_cast %29 : vector<8x128xf32> to vector<1x8x128xf32>
    %49 = vector.shape_cast %47 : vector<4x128xf32> to vector<4x1x128xf32>
    %50 = vector.broadcast %48 : vector<1x8x128xf32> to vector<4x8x128xf32>
    %51 = vector.broadcast %49 : vector<4x1x128xf32> to vector<4x8x128xf32>
    %52 = arith.mulf %50, %51 : vector<4x8x128xf32>
    %53 = vector.shape_cast %52 : vector<4x8x128xf32> to vector<32x128xf32>
    %cst_19 = arith.constant dense<0.000000e+00> : vector<32x8xf32>
    %54 = tpu.matmul %53, %32, %cst_19 {dimension_numbers = #tpu.dot_dimension_numbers<[1], [1], [0], [0], [0, 0, 1, 0], [], []>} : vector<32x128xf32>, vector<8x128xf32>, vector<32x8xf32> -> vector<32x8xf32>
    %cst_20 = arith.constant 0.176776692 : f32
    %55 = vector.broadcast %cst_20 : f32 to vector<32x8xf32>
    %56 = arith.mulf %54, %55 : vector<32x8xf32>
    %57 = tpu.iota {dimensions = array<i32: 0>} : vector<8x8xi32>
    %58 = tpu.iota {dimensions = array<i32: 1>} : vector<8x8xi32>
    %59 = vector.broadcast %1 : i32 to vector<8x8xi32>
    %60 = arith.cmpi slt, %57, %59 : vector<8x8xi32>
    %61 = vector.broadcast %1 : i32 to vector<8x8xi32>
    %62 = arith.cmpi slt, %58, %61 : vector<8x8xi32>
    %63 = arith.andi %60, %62 : vector<8x8xi1>
    %cst_21 = arith.constant 1.000000e+00 : f32
    %cst_22 = arith.constant 0.000000e+00 : f32
    %64 = vector.broadcast %cst_21 : f32 to vector<8x8xf32>
    %65 = vector.broadcast %cst_22 : f32 to vector<8x8xf32>
    %66 = arith.select %63, %64, %65 : vector<8x8xi1>, vector<8x8xf32>
    %67 = vector.shape_cast %66 : vector<8x8xf32> to vector<1x8x8xf32>
    %68 = vector.shape_cast %67 : vector<1x8x8xf32> to vector<1x8x8xf32>
    %69 = vector.broadcast %68 : vector<1x8x8xf32> to vector<4x8x8xf32>
    %70 = vector.shape_cast %69 : vector<4x8x8xf32> to vector<32x8xf32>
    %cst_23 = arith.constant 5.000000e-01 : f32
    %71 = vector.broadcast %cst_23 : f32 to vector<32x8xf32>
    %72 = arith.cmpf ogt, %70, %71 : vector<32x8xf32>
    %cst_24 = arith.constant -1.000000e+30 : f32
    %73 = vector.broadcast %cst_24 : f32 to vector<32x8xf32>
    %74 = arith.select %72, %56, %73 : vector<32x8xi1>, vector<32x8xf32>
    %cst_25 = arith.constant dense<0xFF800000> : vector<32xf32>
    %75 = vector.multi_reduction <maximumf>, %74, %cst_25 [1] : vector<32x8xf32> to vector<32xf32>
    %76 = vector.shape_cast %75 : vector<32xf32> to vector<32x1xf32>
    %77 = vector.broadcast %76 : vector<32x1xf32> to vector<32x8xf32>
    %78 = arith.subf %74, %77 : vector<32x8xf32>
    %79 = math.exp %78 : vector<32x8xf32>
    %cst_26 = arith.constant dense<0.000000e+00> : vector<32xf32>
    %80 = vector.multi_reduction <add>, %79, %cst_26 [1] : vector<32x8xf32> to vector<32xf32>
    %81 = vector.shape_cast %80 : vector<32xf32> to vector<32x1xf32>
    %82 = tpu.reciprocal %81 {approx = true} : vector<32x1xf32> -> vector<32x1xf32>
    %83 = vector.broadcast %82 : vector<32x1xf32> to vector<32x8xf32>
    %84 = arith.mulf %79, %83 : vector<32x8xf32>
    %85 = arith.mulf %84, %70 : vector<32x8xf32>
    %cst_27 = arith.constant dense<0.000000e+00> : vector<32x128xf32>
    %86 = tpu.matmul %85, %33, %cst_27 {dimension_numbers = #tpu.dot_dimension_numbers<[1], [0], [0], [1], [0, 0, 1, 1], [], []>} : vector<32x8xf32>, vector<8x128xf32>, vector<32x128xf32> -> vector<32x128xf32>
    %87 = vector.shape_cast %86 : vector<32x128xf32> to vector<4x8x128xf32>
    %88 = vector.shape_cast %47 : vector<4x128xf32> to vector<4x1x128xf32>
    %89 = vector.broadcast %88 : vector<4x1x128xf32> to vector<4x8x128xf32>
    %90 = arith.mulf %87, %89 : vector<4x8x128xf32>
    %cst_28 = arith.constant dense<0.000000e+00> : vector<8x128xf32>
    %91 = vector.multi_reduction <add>, %90, %cst_28 [0] : vector<4x8x128xf32> to vector<8x128xf32>
    %c0_29 = arith.constant 0 : index
    %c0_30 = arith.constant 0 : index
    %92 = vector.load %arg7[%c0_29, %c0_30] : memref<128x128xf32, #tpu.memory_space<vmem>>, vector<128x128xf32>
    %cst_31 = arith.constant dense<0.000000e+00> : vector<8x128xf32>
    %93 = tpu.matmul %91, %92, %cst_31 {dimension_numbers = #tpu.dot_dimension_numbers<[1], [0], [0], [1], [0, 0, 1, 1], [], []>} : vector<8x128xf32>, vector<128x128xf32>, vector<8x128xf32> -> vector<8x128xf32>
    %94 = arith.addf %3, %93 : vector<8x128xf32>
    %c0_32 = arith.constant 0 : index
    %c0_33 = arith.constant 0 : index
    %95 = vector.load %arg8[%c0_32, %c0_33] : memref<1x128xf32, #tpu.memory_space<vmem>>, vector<1x128xf32>
    %c0_34 = arith.constant 0 : index
    %c0_35 = arith.constant 0 : index
    %96 = vector.load %arg9[%c0_34, %c0_35] : memref<1x128xf32, #tpu.memory_space<vmem>>, vector<1x128xf32>
    %cst_36 = arith.constant dense<0.000000e+00> : vector<8xf32>
    %97 = vector.multi_reduction <add>, %94, %cst_36 [1] : vector<8x128xf32> to vector<8xf32>
    %98 = vector.shape_cast %97 : vector<8xf32> to vector<8x1xf32>
    %cst_37 = arith.constant 1.280000e+02 : f32
    %99 = vector.broadcast %cst_37 : f32 to vector<8x1xf32>
    %100 = arith.divf %98, %99 : vector<8x1xf32>
    %101 = vector.broadcast %100 : vector<8x1xf32> to vector<8x128xf32>
    %102 = arith.subf %94, %101 : vector<8x128xf32>
    %103 = arith.mulf %102, %102 : vector<8x128xf32>
    %cst_38 = arith.constant dense<0.000000e+00> : vector<8xf32>
    %104 = vector.multi_reduction <add>, %103, %cst_38 [1] : vector<8x128xf32> to vector<8xf32>
    %105 = vector.shape_cast %104 : vector<8xf32> to vector<8x1xf32>
    %cst_39 = arith.constant 1.280000e+02 : f32
    %106 = vector.broadcast %cst_39 : f32 to vector<8x1xf32>
    %107 = arith.divf %105, %106 : vector<8x1xf32>
    %108 = vector.broadcast %100 : vector<8x1xf32> to vector<8x128xf32>
    %109 = arith.subf %94, %108 : vector<8x128xf32>
    %cst_40 = arith.constant 9.99999974E-6 : f32
    %110 = vector.broadcast %cst_40 : f32 to vector<8x1xf32>
    %111 = arith.addf %107, %110 : vector<8x1xf32>
    %112 = math.rsqrt %111 : vector<8x1xf32>
    %113 = vector.broadcast %112 : vector<8x1xf32> to vector<8x128xf32>
    %114 = arith.mulf %109, %113 : vector<8x128xf32>
    %115 = vector.broadcast %95 : vector<1x128xf32> to vector<8x128xf32>
    %116 = arith.mulf %114, %115 : vector<8x128xf32>
    %117 = vector.broadcast %96 : vector<1x128xf32> to vector<8x128xf32>
    %118 = arith.addf %116, %117 : vector<8x128xf32>
    %c0_41 = arith.constant 0 : index
    %c0_42 = arith.constant 0 : index
    %119 = vector.load %arg10[%c0_41, %c0_42] : memref<128x256xf32, #tpu.memory_space<vmem>>, vector<128x256xf32>
    %cst_43 = arith.constant dense<0.000000e+00> : vector<8x256xf32>
    %120 = tpu.matmul %118, %119, %cst_43 {dimension_numbers = #tpu.dot_dimension_numbers<[1], [0], [0], [1], [0, 0, 1, 1], [], []>} : vector<8x128xf32>, vector<128x256xf32>, vector<8x256xf32> -> vector<8x256xf32>
    %c0_44 = arith.constant 0 : index
    %c0_45 = arith.constant 0 : index
    %121 = vector.load %arg11[%c0_44, %c0_45] : memref<1x256xf32, #tpu.memory_space<vmem>>, vector<1x256xf32>
    %122 = vector.broadcast %121 : vector<1x256xf32> to vector<8x256xf32>
    %123 = arith.addf %120, %122 : vector<8x256xf32>
    %cst_46 = arith.constant 0.000000e+00 : f32
    %124 = vector.broadcast %cst_46 : f32 to vector<8x256xf32>
    %125 = arith.maximumf %123, %124 : vector<8x256xf32>
    %c0_47 = arith.constant 0 : index
    %c0_48 = arith.constant 0 : index
    %126 = vector.load %arg12[%c0_47, %c0_48] : memref<256x128xf32, #tpu.memory_space<vmem>>, vector<256x128xf32>
    %cst_49 = arith.constant dense<0.000000e+00> : vector<8x128xf32>
    %127 = tpu.matmul %125, %126, %cst_49 {dimension_numbers = #tpu.dot_dimension_numbers<[1], [0], [0], [1], [0, 0, 1, 1], [], []>} : vector<8x256xf32>, vector<256x128xf32>, vector<8x128xf32> -> vector<8x128xf32>
    %c0_50 = arith.constant 0 : index
    %c0_51 = arith.constant 0 : index
    %128 = vector.load %arg13[%c0_50, %c0_51] : memref<1x128xf32, #tpu.memory_space<vmem>>, vector<1x128xf32>
    %129 = vector.broadcast %128 : vector<1x128xf32> to vector<8x128xf32>
    %130 = arith.addf %127, %129 : vector<8x128xf32>
    %131 = arith.addf %94, %130 : vector<8x128xf32>
    %c0_52 = arith.constant 0 : index
    %c0_53 = arith.constant 0 : index
    %c0_54 = arith.constant 0 : index
    %132 = vector.load %arg14[%c0_52, %c0_53, %c0_54] : memref<1x8x128xf32, #tpu.memory_space<vmem>>, vector<1x8x128xf32>
    %133 = vector.shape_cast %132 : vector<1x8x128xf32> to vector<8x128xf32>
    %134 = vector.shape_cast %131 : vector<8x128xf32> to vector<1x8x128xf32>
    tpu.vector_store %arg14[%c0_52, %c0_53, %c0_54], %134 {strides = array<i32>} : memref<1x8x128xf32, #tpu.memory_space<vmem>>, vector<1x8x128xf32>,
    return
  }
  func.func @transform_0(%arg0: i32, %arg1: memref<3xi32, #tpu.memory_space<smem>>) -> (i32, i32, i32) {
    %c0_i32 = arith.constant 0 : i32
    %c0_i32_0 = arith.constant 0 : i32
    %c0_i32_1 = arith.constant 0 : i32
    return %arg0, %c0_i32, %c0_i32_0 : i32, i32, i32
  }
  func.func @transform_1(%arg0: i32, %arg1: memref<3xi32, #tpu.memory_space<smem>>) -> (i32, i32) {
    %c0_i32 = arith.constant 0 : i32
    %c0_i32_0 = arith.constant 0 : i32
    %c0_i32_1 = arith.constant 0 : i32
    return %c0_i32, %c0_i32_0 : i32, i32
  }
  func.func @transform_2(%arg0: i32, %arg1: memref<3xi32, #tpu.memory_space<smem>>) -> (i32, i32) {
    %c0_i32 = arith.constant 0 : i32
    %c0_i32_0 = arith.constant 0 : i32
    %c0_i32_1 = arith.constant 0 : i32
    return %c0_i32, %c0_i32_0 : i32, i32
  }
  func.func @transform_3(%arg0: i32, %arg1: memref<3xi32, #tpu.memory_space<smem>>) -> (i32, i32) {
    %c0_i32 = arith.constant 0 : i32
    %c0_i32_0 = arith.constant 0 : i32
    %c0_i32_1 = arith.constant 0 : i32
    return %c0_i32, %c0_i32_0 : i32, i32
  }
  func.func @transform_4(%arg0: i32, %arg1: memref<3xi32, #tpu.memory_space<smem>>) -> (i32, i32) {
    %c0_i32 = arith.constant 0 : i32
    %c0_i32_0 = arith.constant 0 : i32
    %c0_i32_1 = arith.constant 0 : i32
    return %c0_i32, %c0_i32_0 : i32, i32
  }
  func.func @transform_5(%arg0: i32, %arg1: memref<3xi32, #tpu.memory_space<smem>>) -> (i32, i32) {
    %c0_i32 = arith.constant 0 : i32
    %c0_i32_0 = arith.constant 0 : i32
    %c0_i32_1 = arith.constant 0 : i32
    return %c0_i32, %c0_i32_0 : i32, i32
  }
  func.func @transform_6(%arg0: i32, %arg1: memref<3xi32, #tpu.memory_space<smem>>) -> (i32, i32) {
    %c0_i32 = arith.constant 0 : i32
    %c0_i32_0 = arith.constant 0 : i32
    %c0_i32_1 = arith.constant 0 : i32
    return %c0_i32, %c0_i32_0 : i32, i32
  }
  func.func @transform_7(%arg0: i32, %arg1: memref<3xi32, #tpu.memory_space<smem>>) -> (i32, i32) {
    %c0_i32 = arith.constant 0 : i32
    %c0_i32_0 = arith.constant 0 : i32
    %c0_i32_1 = arith.constant 0 : i32
    return %c0_i32, %c0_i32_0 : i32, i32
  }
  func.func @transform_8(%arg0: i32, %arg1: memref<3xi32, #tpu.memory_space<smem>>) -> (i32, i32) {
    %c0_i32 = arith.constant 0 : i32
    %c0_i32_0 = arith.constant 0 : i32
    %c0_i32_1 = arith.constant 0 : i32
    return %c0_i32, %c0_i32_0 : i32, i32
  }
  func.func @transform_9(%arg0: i32, %arg1: memref<3xi32, #tpu.memory_space<smem>>) -> (i32, i32) {
    %c0_i32 = arith.constant 0 : i32
    %c0_i32_0 = arith.constant 0 : i32
    %c0_i32_1 = arith.constant 0 : i32
    return %c0_i32, %c0_i32_0 : i32, i32
  }
  func.func @transform_10(%arg0: i32, %arg1: memref<3xi32, #tpu.memory_space<smem>>) -> (i32, i32) {
    %c0_i32 = arith.constant 0 : i32
    %c0_i32_0 = arith.constant 0 : i32
    %c0_i32_1 = arith.constant 0 : i32
    return %c0_i32, %c0_i32_0 : i32, i32
  }
  func.func @transform_11(%arg0: i32, %arg1: memref<3xi32, #tpu.memory_space<smem>>) -> (i32, i32) {
    %c0_i32 = arith.constant 0 : i32
    %c0_i32_0 = arith.constant 0 : i32
    %c0_i32_1 = arith.constant 0 : i32
    return %c0_i32, %c0_i32_0 : i32, i32
  }
  func.func @transform_12(%arg0: i32, %arg1: memref<3xi32, #tpu.memory_space<smem>>) -> (i32, i32, i32) {
    %c0_i32 = arith.constant 0 : i32
    %c0_i32_0 = arith.constant 0 : i32
    %c0_i32_1 = arith.constant 0 : i32
    return %arg0, %c0_i32, %c0_i32_0 : i32, i32, i32
  }
}

</mosaic_0001>

<bundles_post_ra>
// kernel: tpu_custom_call.1
= control target key start
LH: loop header
LB: loop body
LE: loop exit
PB: predicated region body
PF: predicated region fallthrough
CT: control target
= control target key end

     0   :  { %s2767_s0 = inlined_call_operand.hbm [shape: s32[3], index: 0, kind: input, shape index: {}]   ;;  %s2768_s1 = inlined_call_operand.hbm [shape: f32[3,8,128], index: 1, kind: input, shape index: {}]   ;;  %s2769_s2 = inlined_call_operand.vmem [shape: f32[1,128], index: 2, kind: input, shape index: {}]   ;;  %s2770_s3 = inlined_call_operand.vmem [shape: f32[1,128], index: 3, kind: input, shape index: {}]   ;;  %s2771_s4 = inlined_call_operand.hbm [shape: f32[128,128], index: 4, kind: input, shape index: {}]   ;;  %s2772_s5 = inlined_call_operand.hbm [shape: f32[128,256], index: 5, kind: input, shape index: {}]   ;;  %s2773_s6 = inlined_call_operand.hbm [shape: f32[128,128], index: 6, kind: input, shape index: {}]   ;;  %s2774_s7 = inlined_call_operand.vmem [shape: f32[1,128], index: 7, kind: input, shape index: {}]   ;;  %s2775_s8 = inlined_call_operand.vmem [shape: f32[1,128], index: 8, kind: input, shape index: {}]   ;;  %s2776_s9 = inlined_call_operand.hbm [shape: f32[128,256], index: 9, kind: input, shape index: {}]   ;;  %s2777_s10 = inlined_call_operand.vmem [shape: f32[1,256], index: 10, kind: input, shape index: {}]   ;;  %s2778_s11 = inlined_call_operand.hbm [shape: f32[256,128], index: 11, kind: input, shape index: {}]   ;;  %s2779_s12 = inlined_call_operand.vmem [shape: f32[1,128], index: 12, kind: input, shape index: {}]   ;;  %s2780_s13 = inlined_call_operand.hbm [shape: f32[3,8,128], index: 13, kind: output, shape index: {}]  }
   0x1   :  { %2787 = sst [smem:[#allocation22_spill]] %s2771_s4  ;;  %s1978_s27 = scalar_lea.hbm %s2767_s0, 16 }
   0x2   :  { %2788 = sst [smem:[#allocation23_spill]] %s2773_s6  ;;  %p1979_p0 = scmp.ne.s32.totalorder %s2767_s0, %s1978_s27 }
   0x3   :  { %2789 = sst [smem:[#allocation24_spill]] %s2775_s8  ;;  %p1982_p1 = scmp.lt.u32.totalorder %s1978_s27, %s2767_s0 }
   0x4   :  { %2790 = sst [smem:[#allocation25_spill]] %s2777_s10 }
   0x5   :  { %2791 = sst [smem:[#allocation26_spill]] %s2779_s12  ;;  %p1984_p2 = pnand %p1982_p1, %p1979_p0 }
   0x6   :  { %2792 = sst [smem:[#allocation27_spill]] %s2780_s13 }
   0x7   :  { %1987 = shalt.err (!%p1984_p2)  }
   0x8   :  { %s2240_s15 = smov [#allocation3]  }
   0x9   :  { %19 = dma.hbm_to_smem %s2767_s0, 16, %s2240_s15, [#allocation2] }
   0xa   :  { %2202 = dma.done.wait [#allocation2], 16 }
   0xb   :  { %2203 = vsyncadd [#allocation2], 4294967280 }
   0xc   :  { %21 = sfence }
   0xd   :  { %22 = vsyncpa [#allocation5], 0 }
   0xe   :  { %24 = vsyncpa [#allocation5 + $0x1], 0 }
   0xf   :  { %25 = vsyncpa [#allocation8], 0 }
  0x10   :  { %26 = vsyncpa [#allocation11], 0 }
  0x11   :  { %27 = vsyncpa [#allocation14], 0 }
  0x12   :  { %28 = vsyncpa [#allocation6], 0 }
  0x13   :  { %30 = vsyncpa [#allocation6 + $0x1], 0  ;;  %s2338_s18 = smov 0   ;;  %s2340_s19 = smov 0  }
  0x14   :  { %s2342_s20 = smov 0   ;;  %s2344_s21 = smov 0  }
  0x15 LB: > { %s2241_s0 = smov [#allocation7]   ;;  %s2359_s23 = sadd.s32 4294967295, %s2238_s21   ;;  %s2238_s21 = sphi %s2344_s21, %s2821_s21   ;;  %s2234_s20 = sphi %s2342_s20, %s2820_s20   ;;  %s2230_s19 = sphi %s2340_s19, %s2819_s19   ;;  %s2226_s18 = sphi %s2338_s18, %s2818_s18  }
  0x16   : > { %s342_s22 = sshll.u32 %s2241_s0, 4  ;;  %p1513_p3 = scmp.ge.s32.totalorder %s2238_s21, 1  ;;  %s2364_s22 = int_to_ptr.vmem [resolvable:$true] %s342_s22 }
  0x17   : > { %p2784_p4 = scmp.eq.s32.totalorder %s2359_s23, 0  ;;  %p324_p5 = scmp.lt.s32.totalorder %s2238_s21, 4 }
  0x18   : > { %s2242_s25 = smov [#allocation10]   ;;  %s2243_s28 = smov [#allocation9]  }
  0x19   : > { %p2366_p6 = pnand %p1513_p3, %p324_p5  ;;  %s368_s26 = sshll.u32 %s2242_s25, 4  ;;  %s2378_s26 = int_to_ptr.vmem [resolvable:$true] %s368_s26 }
  0x1a   : > { %s355_s29 = sshll.u32 %s2243_s28, 4  ;;  %s2795_s4 = sld [smem:[#allocation22_spill]]  ;;  %s2380_s29 = int_to_ptr.vmem [resolvable:$true] %s355_s29 }
  0x1b   : > { %s2793_s24 = scalar_select %p2366_p6, 1, 0 }
  0x1c   : > { %p1876_p7 = pneg %p2366_p6 }
  0x1e   : > { %p2374_p8 = pnand %p1876_p7, %p2784_p4 }
  0x20   : > { %s1988_s15 = scalar_lea.hbm %s2795_s4, 2048  ;;  %p2390_p10 = pneg %p2374_p8 }
  0x21   : > { %p1989_p9 = scmp.ne.s32.totalorder %s2795_s4, %s1988_s15  ;;  %p1995_p13 = scmp.lt.u32.totalorder %s1988_s15, %s2795_s4 }
  0x23   : > { %p1991_p11 = pnand %p2390_p10, %p1989_p9 }
  0x25   : > { %p1992_p12 = pneg %p1991_p11 }
  0x27   : > { %p1997_p0 = pnand %p1995_p13, %p1992_p12 }
  0x29   : > { %2000 = shalt.err (!%p1997_p0)
}
  0x2a   : > { %s2001_s30 = scalar_lea.vmem %s2364_s22, 2048  ;;  %p2009_p5 = scmp.lt.s32.totalorder %s2364_s22, %s2364_s22 }
  0x2b   : > { %p2002_p1 = scmp.ne.s32.totalorder %s2364_s22, %s2001_s30  ;;  %p2010_p7 = scmp.lt.s32.totalorder %s2001_s30, %s2001_s30 }
  0x2d   : > { %p2004_p2 = pnand %p2002_p1, %p2390_p10  ;;  %p2011_p9 = por %p2010_p7, %p2009_p5 }
  0x2f   : > { %p2005_p3 = pneg %p2004_p2 }
  0x31   : > { %p2012_p11 = pnand %p2011_p9, %p2005_p3 }
  0x33   : > { %2015 = shalt.err (!%p2012_p11)
}
  0x34   : > { %s2782_s14 = smov 128   ;;  %s2783_s15 = smov 8  }
  0x35   : > { %1879 = dma.hbm_to_vmem [thread:$0]  (!%p2374_p8), %s2795_s4, 2048, %s2364_s22, [#allocation8], %s2782_s14, %s2782_s14, %s2783_s15  }
  0x36   : > { %s2797_s6 = sld [smem:[#allocation23_spill]] }
  0x3c   : > { %s2016_s30 = scalar_lea.hbm %s2797_s6, 2048 }
  0x3d   : > { %p2017_p12 = scmp.ne.s32.totalorder %s2797_s6, %s2016_s30  ;;  %p2023_p1 = scmp.lt.u32.totalorder %s2016_s30, %s2797_s6 }
  0x3f   : > { %p2019_p13 = pnand %p2017_p12, %p2390_p10 }
  0x41   : > { %p2020_p0 = pneg %p2019_p13 }
  0x43   : > { %p2025_p2 = pnand %p2023_p1, %p2020_p0 }
  0x45   : > { %2028 = shalt.err (!%p2025_p2)
}
  0x46   : > { %s2029_s22 = scalar_lea.vmem %s2378_s26, 2048  ;;  %p2037_p9 = scmp.lt.s32.totalorder %s2378_s26, %s2378_s26 }
  0x47   : > { %p2030_p3 = scmp.ne.s32.totalorder %s2378_s26, %s2029_s22  ;;  %p2038_p11 = scmp.lt.s32.totalorder %s2029_s22, %s2029_s22 }
  0x49   : > { %p2032_p5 = pnand %p2030_p3, %p2390_p10  ;;  %p2039_p12 = por %p2038_p11, %p2037_p9 }
  0x4b   : > { %p2033_p7 = pneg %p2032_p5 }
  0x4d   : > { %p2040_p13 = pnand %p2039_p12, %p2033_p7 }
  0x4f   : > { %2043 = shalt.err (!%p2040_p13)
}
  0x50   : > { %1885 = dma.hbm_to_vmem [thread:$0]  (!%p2374_p8), %s2797_s6, 2048, %s2378_s26, [#allocation11], %s2782_s14, %s2782_s14, %s2783_s15  }
  0x51   : > { %s2044_s16 = scalar_lea.hbm %s2772_s5, 4096 }
  0x52   : > { %p2045_p0 = scmp.ne.s32.totalorder %s2772_s5, %s2044_s16  ;;  %p2051_p3 = scmp.lt.u32.totalorder %s2044_s16, %s2772_s5 }
  0x54   : > { %p2047_p1 = pnand %p2045_p0, %p2390_p10 }
  0x56   : > { %p2048_p2 = pneg %p2047_p1 }
  0x58   : > { %p2053_p5 = pnand %p2051_p3, %p2048_p2 }
  0x5a   : > { %2056 = shalt.err (!%p2053_p5)
}
  0x5b   : > { %s2057_s26 = scalar_lea.vmem %s2380_s29, 4096  ;;  %p2065_p12 = scmp.lt.s32.totalorder %s2380_s29, %s2380_s29 }
  0x5c   : > { %p2058_p7 = scmp.ne.s32.totalorder %s2380_s29, %s2057_s26  ;;  %p2066_p13 = scmp.lt.s32.totalorder %s2057_s26, %s2057_s26 }
  0x5e   : > { %p2060_p9 = pnand %p2058_p7, %p2390_p10  ;;  %p2067_p0 = por %p2066_p13, %p2065_p12 }
  0x60   : > { %p2061_p11 = pneg %p2060_p9 }
  0x62   : > { %p2068_p1 = pnand %p2067_p0, %p2061_p11 }
  0x64   : > { %2071 = shalt.err (!%p2068_p1)
}
  0x65   : > { %s2246_s22 = smov 256   ;;  %s2247_s8 = smov 16  }
  0x66   : > { %1882 = dma.hbm_to_vmem [thread:$0]  (!%p2374_p8), %s2772_s5, 4096, %s2380_s29, [#allocation8], %s2246_s22, %s2246_s22, %s2247_s8  }
  0x67   : > { %s2248_s13 = smov [#allocation12]   ;;  %s2249_s17 = smov [#allocation13]  }
  0x68   : > { %s387_s16 = sshll.u32 %s2248_s13, 4  ;;  %s403_s25 = sshll.u32 %s2249_s17, 4  ;;  %s388_s16 = int_to_ptr.vmem [resolvable:$true] %s387_s16  ;;  %s404_s25 = int_to_ptr.vmem [resolvable:$true] %s403_s25 }
  0x69   : > { %s2072_s26 = scalar_lea.hbm %s2776_s9, 4096 }
  0x6a   : > { %p2073_p2 = scmp.ne.s32.totalorder %s2776_s9, %s2072_s26  ;;  %p2079_p7 = scmp.lt.u32.totalorder %s2072_s26, %s2776_s9 }
  0x6c   : > { %p2075_p3 = pnand %p2073_p2, %p2390_p10 }
  0x6e   : > { %p2076_p5 = pneg %p2075_p3 }
  0x70   : > { %p2081_p9 = pnand %p2079_p7, %p2076_p5 }
  0x72   : > { %2084 = shalt.err (!%p2081_p9)
}
  0x73   : > { %s2085_s29 = scalar_lea.vmem %s388_s16, 4096  ;;  %p2093_p0 = scmp.lt.s32.totalorder %s388_s16, %s388_s16 }
  0x74   : > { %p2086_p11 = scmp.ne.s32.totalorder %s388_s16, %s2085_s29  ;;  %p2094_p1 = scmp.lt.s32.totalorder %s2085_s29, %s2085_s29 }
  0x76   : > { %p2088_p12 = pnand %p2086_p11, %p2390_p10  ;;  %p2095_p4 = por %p2094_p1, %p2093_p0 }
  0x78   : > { %p2089_p13 = pneg %p2088_p12 }
  0x7a   : > { %p2096_p6 = pnand %p2095_p4, %p2089_p13 }
  0x7c   : > { %2099 = shalt.err (!%p2096_p6)
}
  0x7d   : > { %1888 = dma.hbm_to_vmem [thread:$0]  (!%p2374_p8), %s2776_s9, 4096, %s388_s16, [#allocation11], %s2246_s22, %s2246_s22, %s2247_s8  }
  0x7e   : > { %s2100_s10 = scalar_lea.hbm %s2778_s11, 4096 }
  0x7f   : > { %p2101_p2 = scmp.ne.s32.totalorder %s2778_s11, %s2100_s10  ;;  %p2107_p6 = scmp.lt.u32.totalorder %s2100_s10, %s2778_s11 }
  0x81   : > { %p2103_p3 = pnand %p2101_p2, %p2390_p10 }
  0x83   : > { %p2104_p4 = pneg %p2103_p3 }
  0x85   : > { %p2109_p5 = pnand %p2107_p6, %p2104_p4 }
  0x87   : > { %2112 = shalt.err (!%p2109_p5)
}
  0x88   : > { %s2113_s30 = scalar_lea.vmem %s404_s25, 4096  ;;  %p2121_p12 = scmp.lt.s32.totalorder %s404_s25, %s404_s25 }
  0x89   : > { %p2114_p7 = scmp.ne.s32.totalorder %s404_s25, %s2113_s30  ;;  %p2122_p13 = scmp.lt.s32.totalorder %s2113_s30, %s2113_s30 }
  0x8b   : > { %p2116_p9 = pnand %p2114_p7, %p2390_p10  ;;  %p2123_p0 = por %p2122_p13, %p2121_p12 }
  0x8d   : > { %p2117_p11 = pneg %p2116_p9 }
  0x8f   : > { %p2124_p1 = pnand %p2123_p0, %p2117_p11 }
  0x91   : > { %2127 = shalt.err (!%p2124_p1)
}
  0x92   : > { %s2798_s22 = smov 8   ;;  %s2799_s8 = smov 128  }
  0x93   : > { %1891 = dma.hbm_to_vmem [thread:$0]  (!%p2374_p8), %s2778_s11, 4096, %s404_s25, [#allocation14], %s2799_s8, %s2799_s8, %s2798_s22  }
  0x94   : > { %s1512_s27 = sadd.s32 4294967294, %s2238_s21   ;;  %s2504_s0 = sadd.s32 1, %s2238_s21  }
  0x95   : > { %s43_s29 = sadd.s32 1, %s2234_s20  ;;  %s40_s14 = ssub.s32 %s2238_s21, %s2504_s0 }
  0x96   : > { %p50_p10 = scmp.ne.s32.totalorder %s2234_s20, %s2230_s19  ;;  %p41_p2 = scmp.eq.s32.totalorder %s40_s14, 0 }
  0x97   : > { %p51_p3 = scmp.eq.s32.totalorder %s2238_s21, 0  ;;  %p56_p4 = scmp.ne.s32.totalorder %s2230_s19, %s2226_s18 }
  0x98   : > { %p311_p6 = scmp.eq.s32.totalorder %s2359_s23, 2  ;;  %p2800_p7 = scmp.eq.s32.totalorder %s2359_s23, 0 }
  0x99   : > { %s2516_s15 = scalar_select %p41_p2, %s2234_s20, %s43_s29  }
  0x9a   : > { %p52_p5 = por %p51_p3, %p50_p10  ;;  %p2520_p9 = por %p2800_p7, %p56_p4 }
  0x9b   : > { %p2524_p8 = por %p311_p6, %p50_p10  ;;  %p317_p11 = scmp.eq.s32.totalorder %s1512_s27, 2 }
  0x9c   : > { %p1905_p12 = scmp.lt.s32.totalorder %s2238_s21, 3  ;;  %s420_s6 = sand.u32 1, %s2234_s20  }
  0x9d   : > { %s2802_s25 = scalar_select %p2524_p8, 1, 0 }
  0x9e   : > { %p2530_p13 = por %p317_p11, %p56_p4  ;;  %s1520_s12 = sshll.u32 %s420_s6, 3 }
  0x9f   : > { %s1521_s13 = sshll.u32 %s2238_s21, 7  ;;  %s424_s22 = scalar_lea.vmem [#allocation4], %s1520_s12 }
  0xa0   : > { %s2803_s10 = scalar_select %p2530_p13, 1, 0 }
  0xa1   : > { %s2538_s30 = scalar_lea.hbm %s2768_s1, %s1521_s13  ;;  %s431_s8 = sshll.u32 %s424_s22, 4  ;;  %s2544_s8 = int_to_ptr.vmem [resolvable:$true] %s431_s8 }
  0xa2   : > { %p2540_p0 = pnand %p1905_p12, %p52_p5  ;;  %s421_s26 = scalar_lea.sflag [#allocation5], %s420_s6 }
  0xa3   : > { %s2128_s27 = scalar_lea.hbm %s2538_s30, 128  ;;  %s2133_s12 = scalar_lea.hbm %s2768_s1, 384 }
  0xa4   : > { %p2129_p1 = scmp.ne.s32.totalorder %s2538_s30, %s2128_s27  ;;  %p2130_p10 = pneg %p2540_p0 }
  0xa5   : > { %p2134_p4 = scmp.lt.u32.totalorder %s2538_s30, %s2768_s1  ;;  %p2135_p6 = scmp.lt.u32.totalorder %s2133_s12, %s2128_s27 }
  0xa6   : > { %p2131_p2 = pnand %p2130_p10, %p2129_p1  ;;  %p2137_p7 = scmp.lt.u32.totalorder %s2128_s27, %s2538_s30 }
  0xa7   : > { %p2136_p5 = por %p2135_p6, %p2134_p4 }
  0xa8   : > { %p2132_p3 = pneg %p2131_p2 }
  0xa9   : > { %p2138_p11 = por %p2137_p7, %p2136_p5 }
  0xab   : > { %p2139_p12 = pnand %p2138_p11, %p2132_p3 }
  0xad   : > { %2142 = shalt.err (!%p2139_p12)
}
  0xae   : > { %s2143_s6 = scalar_lea.vmem %s2544_s8, 128  ;;  %s2250_s28 = smov [#allocation4]  }
  0xaf   : > { %p2144_p1 = scmp.ne.s32.totalorder %s2544_s8, %s2143_s6  ;;  %s2148_s22 = sshll.u32 %s2250_s28, 4  ;;  %s2149_s22 = int_to_ptr.vmem [resolvable:$false] %s2148_s22 }
  0xb0   : > { %s2150_s29 = scalar_lea.vmem %s2149_s22, 256  ;;  %p2151_p8 = scmp.lt.s32.totalorder %s2544_s8, %s2149_s22 }
  0xb1   : > { %p2146_p2 = pnand %p2144_p1, %p2130_p10  ;;  %p2152_p4 = scmp.lt.s32.totalorder %s2150_s29, %s2143_s6 }
  0xb3   : > { %p2147_p13 = pneg %p2146_p2  ;;  %p2153_p6 = por %p2152_p4, %p2151_p8 }
  0xb5   : > { %p2154_p5 = pnand %p2153_p6, %p2147_p13 }
  0xb7   : > { %2157 = shalt.err (!%p2154_p5)
}
  0xb8   : > { %1895 = dma.hbm_to_vmem [thread:$0]  (!%p2540_p0), %s2538_s30, 128, %s2544_s8, %s421_s26  }
  0xb9   : > { %p2805_p3 = scmp.ne.s32.totalorder %s2793_s24, 0 }
  0xba   : > { %s2574_s27 = sand.u32 (!%p2805_p3), 1, %s2230_s19  }
  0xbb   : > { %440 = sbr.rel (%p2805_p3) target bundleno = 2467 (0x9a3), region = 68  ;;  %s1523_s14 = sshll.u32 (!%p2805_p3), %s2574_s27, 3 }
  0xbc   : > { %s443_s12 = scalar_lea.sflag (!%p2805_p3), [#allocation5], %s2574_s27  ;;  %s446_s13 = scalar_lea.vmem (!%p2805_p3), [#allocation4], %s1523_s14 }
  0xc2   : > { %2205 = dma.done.wait (%p2520_p9), %s443_s12, 128  }
  0xc3   : > { %2207 = vsyncadd (%p2520_p9), %s443_s12, 4294967168  ;;  %p2806_p8 = scmp.eq.s32.totalorder %s2359_s23, 0 }
  0xc5   : > { %2209 = dma.done.wait (%p2806_p8), [#allocation8], 6144   ;;  %p2807_p13 = pmov %p2806_p8 }
  0xc6   : > { %p2808_p0 = pmov %p2806_p8 }
  0xc7   : > { %2211 = vsyncadd (%p2807_p13), [#allocation8], 4294961152 }
  0xc8   : > { %2213 = dma.done.wait (%p2808_p0), [#allocation11], 6144   ;;  %p2809_p10 = pmov %p2808_p0 }
  0xc9   : > { %p2810_p7 = pmov %p2808_p0 }
  0xca   : > { %2215 = vsyncadd (%p2809_p10), [#allocation11], 4294961152 }
  0xcb   : > { %2217 = dma.done.wait (%p2810_p7), [#allocation14], 4096   ;;  %p2811_p11 = pmov %p2808_p0 }
  0xcc   : > { %v2596_v0 = vld [vmem:[%s446_s13] sm:$0xff]  ;;  %v624_v1 = vld [vmem:[#allocation9 + $0x8] sm:$0xff]  ;;  %v623_v3 = vld [vmem:[#allocation9] sm:$0xff]  ;;  %v2251_v6 = vmov 0.0|0.0   ;;  %v2252_v60 = vmov 0.0   ;;  %vm2253_vm0 = vmmov 0  }
  0xcd   : > { %2219 = vsyncadd (%p2811_p11), [#allocation14], 4294963200  ;;  %511 = vadd.xlane.f32.xlu0 %v2596_v0  ;;  %v626_v2 = vld [vmem:[#allocation9 + $0x18] sm:$0xff]  ;;  %v625_v5 = vld [vmem:[#allocation9 + $0x10] sm:$0xff]  ;;  %1708 = vmatprep.subr.bf16.mxu0 %v2251_v6  ;;  %s507_s16 = sld [smem:[#allocation3 + %s2359_s23]]  ;;  %vm885_vm8 = vcmask 64512  }
  0xce   : > { %v1732_v4 = vpack.c.bf16 %v626_v2, %v624_v1  ;;  %v628_v7 = vld [vmem:[#allocation9 + $0x28] sm:$0xff]  ;;  %v630_v8 = vld [vmem:[#allocation9 + $0x38] sm:$0xff]  ;;  %v1734_v9 = vpack.c.bf16 %v625_v5, %v623_v3  ;;  %v537_v11 = vld [vmem:[#allocation7] sm:$0xff]  ;;  %719 = vmatprep.mubr.f32.mxu1 %v2252_v60  ;;  %1654 = vmatprep.mubr.msk.f32.mxu0 %vm2253_vm0, %v2252_v60  ;;  %s2812_s22 = sld [smem:[#allocation24_spill]]  ;;  %s2813_s13 = sld [smem:[#allocation25_spill]] }
  0xcf   : > { %v1736_v10 = vpack.c.bf16 %v630_v8, %v628_v7  ;;  %v538_v12 = vld [vmem:[#allocation7 + $0x8] sm:$0xff]  ;;  %v627_v13 = vld [vmem:[#allocation9 + $0x20] sm:$0xff]  ;;  %v629_v15 = vld [vmem:[#allocation9 + $0x30] sm:$0xff]  ;;  %s2814_s30 = sld [smem:[#allocation26_spill]]  ;;  %s1540_s8 = sshll.u32 %s2359_s23, 7 }
  0xd0   : > { %1733 = vmatprep.subr.bf16.mxu1 %v1732_v4  ;;  %v1709_v14 = vpack.c.bf16 %v538_v12, %v537_v11  ;;  %v632_v16 = vld [vmem:[#allocation9 + $0x48] sm:$0xff]  ;;  %v634_v17 = vld [vmem:[#allocation9 + $0x58] sm:$0xff]  ;;  %v1738_v18 = vpack.c.bf16 %v629_v15, %v627_v13  ;;  %v539_v19 = vld [vmem:[#allocation7 + $0x10] sm:$0xff]  ;;  %s2815_s28 = sld [smem:[#allocation27_spill]]  ;;  %s1381_s29 = scalar_lea.sflag [#allocation6], %s2574_s27 }
  0xd1   : > { %1735 = vmatpush1.bf16.msra.mxu1 %v1734_v9  ;;  %v540_v20 = vld [vmem:[#allocation7 + $0x18] sm:$0xff]  ;;  %v1740_v21 = vpack.c.bf16 %v634_v17, %v632_v16  ;;  %v631_v23 = vld [vmem:[#allocation9 + $0x40] sm:$0xff]  ;;  %v633_v24 = vld [vmem:[#allocation9 + $0x50] sm:$0xff]  ;;  %p2816_p12 = scmp.ne.s32.totalorder %s2802_s25, 0  ;;  %s2255_s23 = smov [#allocation15]  }
  0xd2   : > { %1737 = vmatprep.subr.bf16.mxu1 %v1736_v10  ;;  %1710 = vmatpush3.bf16.msra.mxu0 %v1709_v14  ;;  %v1712_v22 = vpack.c.bf16 %v540_v20, %v539_v19  ;;  %v636_v25 = vld [vmem:[#allocation9 + $0x68] sm:$0xff]  ;;  %v638_v26 = vld [vmem:[#allocation9 + $0x78] sm:$0xff]  ;;  %v541_v27 = vld [vmem:[#allocation7 + $0x20] sm:$0xff]  ;;  %v1742_v29 = vpack.c.bf16 %v633_v24, %v631_v23 }
  0xd3   : > { %1711 = vmatprep.subr.bf16.mxu0 %v2251_v6  ;;  %v542_v28 = vld [vmem:[#allocation7 + $0x28] sm:$0xff]  ;;  %v1744_v30 = vpack.c.bf16 %v638_v26, %v636_v25  ;;  %v635_v32 = vld [vmem:[#allocation9 + $0x60] sm:$0xff]  ;;  %v637_v33 = vld [vmem:[#allocation9 + $0x70] sm:$0xff] }
  0xd4   : > { %v1715_v31 = vpack.c.bf16 %v542_v28, %v541_v27  ;;  %v1746_v34 = vpack.c.bf16 %v637_v33, %v635_v32  ;;  %v640_v39 = vld [vmem:[#allocation9 + $0x88] sm:$0xff]  ;;  %v642_v40 = vld [vmem:[#allocation9 + $0x98] sm:$0xff]  ;;  %v543_v41 = vld [vmem:[#allocation7 + $0x30] sm:$0xff]  ;;  %v726_v28 = vlaneseq }
  0xd5   : > { %1739 = vmatpush1.bf16.msra.mxu1 %v1738_v18  ;;  %v1748_v42 = vpack.c.bf16 %v642_v40, %v640_v39  ;;  %v544_v43 = vld [vmem:[#allocation7 + $0x38] sm:$0xff]  ;;  %v639_v44 = vld [vmem:[#allocation9 + $0x80] sm:$0xff]  ;;  %v641_v45 = vld [vmem:[#allocation9 + $0x90] sm:$0xff] }
  0xd6   : > { %1741 = vmatprep.subr.bf16.mxu1 %v1740_v21  ;;  %1713 = vmatpush3.bf16.msra.mxu0 %v1712_v22  ;;  %v1718_v46 = vpack.c.bf16 %v544_v43, %v543_v41  ;;  %v1750_v47 = vpack.c.bf16 %v641_v45, %v639_v44  ;;  %v644_v48 = vld [vmem:[#allocation9 + $0xa8] sm:$0xff]  ;;  %v646_v49 = vld [vmem:[#allocation9 + $0xb8] sm:$0xff]  ;;  %v545_v50 = vld [vmem:[#allocation7 + $0x40] sm:$0xff] }
  0xd7   : > { %1714 = vmatprep.subr.bf16.mxu0 %v2251_v6  ;;  %v1752_v51 = vpack.c.bf16 %v646_v49, %v644_v48  ;;  %v546_v52 = vld [vmem:[#allocation7 + $0x48] sm:$0xff]  ;;  %v643_v53 = vld [vmem:[#allocation9 + $0xa0] sm:$0xff]  ;;  %v645_v54 = vld [vmem:[#allocation9 + $0xb0] sm:$0xff] }
  0xd8   : > { %v1721_v55 = vpack.c.bf16 %v546_v52, %v545_v50  ;;  %v1754_v56 = vpack.c.bf16 %v645_v54, %v643_v53  ;;  %v648_v57 = vld [vmem:[#allocation9 + $0xc8] sm:$0xff]  ;;  %v650_v58 = vld [vmem:[#allocation9 + $0xd8] sm:$0xff]  ;;  %v547_v59 = vld [vmem:[#allocation7 + $0x50] sm:$0xff] }
  0xd9   : > { %1743 = vmatpush1.bf16.msra.mxu1 %v1742_v29  ;;  %v1756_v61 = vpack.c.bf16 %v650_v58, %v648_v57  ;;  %v548_v62 = vld [vmem:[#allocation7 + $0x58] sm:$0xff]  ;;  %v647_v63 = vld [vmem:[#allocation9 + $0xc0] sm:$0xff]  ;;  %v649_v1 = vld [vmem:[#allocation9 + $0xd0] sm:$0xff]  ;;  %v2626_v29 = vshrl.u32 %v726_v28, 7 }
  0xda   : > { %1745 = vmatprep.subr.bf16.mxu1 %v1744_v30  ;;  %1716 = vmatpush3.bf16.msra.mxu0 %v1715_v31  ;;  %v1724_v2 = vpack.c.bf16 %v548_v62, %v547_v59  ;;  %v1758_v3 = vpack.c.bf16 %v649_v1, %v647_v63  ;;  %v652_v4 = vld [vmem:[#allocation9 + $0xe8] sm:$0xff]  ;;  %v654_v5 = vld [vmem:[#allocation9 + $0xf8] sm:$0xff]  ;;  %v549_v7 = vld [vmem:[#allocation7 + $0x60] sm:$0xff]  ;;  %v729_v31 = vand.u32 127, %v726_v28 }
  0xdb   : > { %1717 = vmatprep.subr.bf16.mxu0 %v2251_v6  ;;  %v1760_v8 = vpack.c.bf16 %v654_v5, %v652_v4  ;;  %v550_v9 = vld [vmem:[#allocation7 + $0x68] sm:$0xff]  ;;  %v651_v10 = vld [vmem:[#allocation9 + $0xe0] sm:$0xff]  ;;  %v653_v11 = vld [vmem:[#allocation9 + $0xf0] sm:$0xff]  ;;  %v732_v30 = vadd.s32 1, %v2626_v29  ;;  %v730_v32 = vmul.u32 32, %v2626_v29 }
  0xdc   : > { %v1727_v12 = vpack.c.bf16 %v550_v9, %v549_v7  ;;  %v1762_v13 = vpack.c.bf16 %v653_v11, %v651_v10  ;;  %v551_v14 = vld [vmem:[#allocation7 + $0x70] sm:$0xff]  ;;  %v552_v15 = vld [vmem:[#allocation7 + $0x78] sm:$0xff]  ;;  %v1530_v21 = vld [vmem:[%s2769_s2] ss:$0 sm:$0xff] }
  0xdd   : > { %1747 = vmatpush1.bf16.msra.mxu1 %v1746_v34  ;;  %v1730_v16 = vpack.c.bf16 %v552_v15, %v551_v14  ;;  %v1531_v23 = vld [vmem:[%s2770_s3] ss:$0 sm:$0xff]  ;;  %v733_v33 = vmul.u32 32, %v732_v30  ;;  %v2254_v34 = vmov 1966171168   ;;  %vm731_vm1 = vcmp.ge.s32.totalorder %v729_v31, %v730_v32 }
  0xde   : > { %1749 = vmatprep.subr.bf16.mxu1 %v1748_v42  ;;  %1719 = vmatpush3.bf16.msra.mxu0 %v1718_v46  ;;  %v2633_v42 = vsub.s32 0, %v2626_v29 }
  0xdf   : > { %1720 = vmatprep.subr.bf16.mxu0 %v2251_v6  ;;  %vm734_vm2 = vcmp.lt.s32.totalorder %v729_v31, %v733_v33 }
  0xe0   : > { %vm735_vm3 = vmand %vm731_vm1, %vm734_vm2 }
  0xe1   : > { %1751 = vmatpush1.bf16.msra.mxu1 %v1750_v47 }
  0xe2   : > { %1753 = vmatprep.subr.bf16.mxu1 %v1752_v51  ;;  %1722 = vmatpush3.bf16.msra.mxu0 %v1721_v55 }
  0xe3   : > { %1723 = vmatprep.subr.bf16.mxu0 %v2251_v6 }
  0xe5   : > { %1755 = vmatpush1.bf16.msra.mxu1 %v1754_v56  ;;  %v875_v56 = vstv %s507_s16  ;;  %s506_s16 = scalar_lea.vmem [#allocation15], %s1523_s14  ;;  %s2162_s14 = sshll.u32 %s2255_s23, 4  ;;  %s2163_s14 = int_to_ptr.vmem [resolvable:$false] %s2162_s14 }
  0xe6   : > { %1757 = vmatprep.subr.bf16.mxu1 %v1756_v61  ;;  %1725 = vmatpush3.bf16.msra.mxu0 %v1724_v2  ;;  %vm876_vm4 = vcmp.lt.s32.totalorder %v2626_v29, %v875_v56  ;;  %vm877_vm5 = vcmp.lt.s32.totalorder %v729_v31, %v875_v56  ;;  %s1394_s26 = sshll.u32 %s506_s16, 4  ;;  %s2726_s26 = int_to_ptr.vmem [resolvable:$true] %s1394_s26 }
  0xe7   : > { %1726 = vmatprep.subr.bf16.mxu0 %v2251_v6  ;;  %vm878_vm6 = vmand %vm876_vm4, %vm877_vm5  ;;  %s2158_s12 = scalar_lea.vmem %s2726_s26, 128  ;;  %p2165_p4 = scmp.lt.s32.totalorder %s2726_s26, %s2163_s14 }
  0xe8   : > { %v2654_v57 = vsel %vm878_vm6, 1.0, %v2252_v60  ;;  %p2159_p9 = scmp.ne.s32.totalorder %s2726_s26, %s2158_s12 }
  0xe9   : > { %1759 = vmatpush1.bf16.msra.mxu1 %v1758_v3  ;;  %vm880_vm7 = vcmp.gt.f32.partialorder %v2654_v57, 0.5 }
  0xea   : > { %1761 = vmatprep.subr.bf16.mxu1 %v1760_v8  ;;  %1728 = vmatpush3.bf16.msra.mxu0 %v1727_v12  ;;  %p2160_p1 = pnand %p2159_p9, %p2816_p12 }
  0xeb   : > { %1729 = vmatprep.subr.bf16.mxu0 %v2251_v6 }
  0xec   : > { %p2161_p2 = pneg %p2160_p1 }
  0xed   : > { %1763 = vmatpush1.bf16.msra.mxu1 %v1762_v13 }
  0xee   : > { %1731 = vmatpush3.bf16.msra.mxu0 %v1730_v16 }
  0xef   : > { %1764 = vmatprep.subr.bf16.mxu0 %v2251_v6 }
  0xf0   : > { %720 = vmatmul.mubr.f32.vlgmr.msra.gmra.mrb[0].mxu1 %v2596_v0 }
 0x15a   : > { %v512_v35 = vpop.xlane.xlu0 %511 }
 0x15b   : > { %v514_v36 = vmul.f32 0.0078125, %v512_v35  ;;  %v739_v35 = vunpack.c.l.s4 %v2254_v34  ;;  %v1038_v34 = vld [vmem:[#allocation10] sm:$0xff] }
 0x15d   : > { %v2604_v37 = vsub.f32 %v2596_v0, %v514_v36  ;;  %v740_v36 = vunpack.c.0.s8 %v739_v35  ;;  %v1039_v35 = vld [vmem:[#allocation10 + $0x8] sm:$0xff] }
 0x15f   : > { %v516_v38 = vmul.f32 %v2604_v37, %v2604_v37 }
 0x161   : > { %517 = vadd.xlane.f32.xlu0 %v516_v38  ;;  %v736_v38 = vsel %vm735_vm3, 1.0, %v2252_v60 }
 0x1c3   : > { %v721_v26 = vpop.f32.mrb[0].mxu1 }
 0x1c4   : > { %1657 = vmatprep.subr.mxu1 %v721_v26  ;;  %v723_v27 = vpop.f32.mrb[1].mxu1 }
 0x1c5   : > { %1658 = vmatpush3.xpose.msra.mxu1 %v721_v26 }
 0x1c6   : > { %1665 = vmatprep.subr.mxu1 %v723_v27 }
 0x1ee   : > { %v518_v17 = vpop.xlane.xlu0 %517 }
 0x1ef   : > { %v519_v18 = vmul.f32 0.0078125, %v518_v17 }
 0x1f1   : > { %v520_v19 = vadd.f32 1e-05, %v519_v18 }
 0x1f3   : > { %1958 = vrsqrt.f32 %v520_v19 }
 0x1fd   : > { %v1959_v20 = vpop.eup %1958 }
 0x1fe   : > { %v522_v22 = vmul.f32 %v1959_v20, %v2604_v37  ;;  %v743_v37 = vsub.s32 %v740_v36, %v2626_v29  ;;  %v1040_v36 = vld [vmem:[#allocation10 + $0x10] sm:$0xff] }
 0x200   : > { %v529_v24 = vmul.f32 %v1530_v21, %v522_v22  ;;  %v744_v39 = vrot.slane %v736_v38, %v743_v37  ;;  %v1041_v38 = vld [vmem:[#allocation10 + $0x18] sm:$0xff] }
 0x202   : > { %v536_v25 = vadd.f32 %v1531_v23, %v529_v24  ;;  %v745_v40 = vcombine.high %v744_v39, %v744_v39  ;;  %v752_v41 = vrot.slane %v744_v39, %v743_v37  ;;  %v1768_v39 = vpack.c.bf16 %v1041_v38, %v1040_v36  ;;  %v1161_v38 = vld [vmem:[#allocation12 + $0x48] sm:$0xff] }
 0x204   : > { %1655 = vmatmul.mubr.f32.vlgmr.msra.gmra.mrb[0].mxu0 %v536_v25  ;;  %v759_v43 = vrot.slane %v745_v40, %v743_v37  ;;  %v760_v44 = vcombine.high %v752_v41, %v752_v41  ;;  %v2639_v46 = vrot.slane %v752_v41, %v2633_v42  ;;  %v1765_v37 = vpack.c.bf16 %v1039_v35, %v1038_v34  ;;  %v1042_v40 = vld [vmem:[#allocation10 + $0x20] sm:$0xff]  ;;  %v1043_v41 = vld [vmem:[#allocation10 + $0x28] sm:$0xff]  ;;  %v1159_v35 = vld [vmem:[#allocation12 + $0x38] sm:$0xff] }
 0x205   : > { %1705 = vmatprep.mubr.msk.f32.mxu0 %vm2253_vm0, %v2252_v60  ;;  %v1157_v34 = vld [vmem:[#allocation12 + $0x28] sm:$0xff] }
 0x206   : > { %v2636_v45 = vrot.slane %v759_v43, %v2633_v42  ;;  %v761_v47 = vcombine.high %v759_v43, %v759_v43  ;;  %v2642_v48 = vrot.slane %v760_v44, %v2633_v42  ;;  %1766 = vmatpush3.bf16.msra.mxu0 %v1765_v37  ;;  %v1771_v43 = vpack.c.bf16 %v1043_v41, %v1042_v40  ;;  %v1044_v44 = vld [vmem:[#allocation10 + $0x30] sm:$0xff]  ;;  %v1160_v41 = vld [vmem:[#allocation12 + $0x40] sm:$0xff] }
 0x207   : > { %1767 = vmatprep.subr.bf16.mxu0 %v2251_v6  ;;  %v1792_v36 = vpack.c.bf16 %v1159_v35, %v1157_v34  ;;  %v1158_v37 = vld [vmem:[#allocation12 + $0x30] sm:$0xff]  ;;  %v1273_v35 = vld [vmem:[#allocation13 + $0x20] sm:$0xff] }
 0x208   : > { %v2647_v53 = vrot.slane %v761_v47, %v2633_v42  ;;  %v1045_v47 = vld [vmem:[#allocation10 + $0x38] sm:$0xff] }
 0x20a   : > { %1769 = vmatpush3.bf16.msra.mxu0 %v1768_v39  ;;  %v1163_v39 = vld [vmem:[#allocation12 + $0x58] sm:$0xff] }
 0x20b   : > { %1770 = vmatprep.subr.bf16.mxu0 %v2251_v6  ;;  %v1796_v40 = vpack.c.bf16 %v1163_v39, %v1161_v38  ;;  %v1275_v39 = vld [vmem:[#allocation13 + $0x30] sm:$0xff] }
 0x20e   : > { %1772 = vmatpush3.bf16.msra.mxu0 %v1771_v43  ;;  %v1162_v43 = vld [vmem:[#allocation12 + $0x50] sm:$0xff] }
 0x20f   : > { %1773 = vmatprep.subr.bf16.mxu0 %v2251_v6 }
 0x2d7   : > { %v619_v49 = vpop.f32.mrb[0].mxu0 }
 0x2d8   : > { %v783_v50 = vmul.f32 %v2636_v45, %v619_v49  ;;  %v1656_v51 = vpop.f32.mrb[1].mxu0  ;;  %v782_v52 = vmul.f32 %v2639_v46, %v619_v49  ;;  %v784_v54 = vmul.f32 %v2642_v48, %v619_v49  ;;  %v785_v55 = vmul.f32 %v2647_v53, %v619_v49 }
 0x2d9   : > { %v1774_v49 = vpack.c.bf16 %v1045_v47, %v1044_v44  ;;  %v1047_v51 = vld [vmem:[#allocation10 + $0x48] sm:$0xff]  ;;  %v1798_v44 = vpack.c.bf16 %v1162_v43, %v1160_v41 }
 0x2da   : > { %1659 = vmatprep.mubr.f32.mxu1 %v782_v52  ;;  %v1294_v41 = vld [vmem:[#allocation13 + $0xc8] sm:$0xff] }
 0x2db   : > { %1660 = vmatmul.mubr.f32.vlgmr.msra.gmra.mrb[2].mxu1 %v783_v50  ;;  %v1046_v50 = vld [vmem:[#allocation10 + $0x40] sm:$0xff]  ;;  %1775 = vmatpush3.bf16.msra.mxu0 %v1774_v49 }
 0x2dc   : > { %1666 = vmatpush3.msra.mxu1 %v723_v27  ;;  %1662 = vmatprep.mubr.f32.mxu1 %v784_v54  ;;  %v1777_v52 = vpack.c.bf16 %v1047_v51, %v1046_v50 }
 0x2dd   : > { %1776 = vmatprep.subr.bf16.mxu0 %v2251_v6 }
 0x2df   : > { %1663 = vmatmul.mubr.f32.gmra.mrb[4].mxu1 %v785_v55  ;;  %1778 = vmatpush3.bf16.msra.mxu0 %v1777_v52  ;;  %v1165_v52 = vld [vmem:[#allocation12 + $0x68] sm:$0xff] }
 0x2e0   : > { %1779 = vmatprep.subr.bf16.mxu0 %v2251_v6 }
 0x3ae   : > { %v1661_v58 = vpop.f32.mrb[2].mxu1 }
 0x3af   : > { %v852_v59 = vpop.f32.mrb[3].mxu1  ;;  %v872_v61 = vmul.f32 0.17677669, %v1661_v58 }
 0x3b0   : > { %v871_v62 = vmul.f32 0.17677669, %v852_v59 }
 0x3b1   : > { %v882_v7 = vsel %vm880_vm7, %v872_v61, -1e+30 }
 0x3b2   : > { %v1664_v63 = vpop.f32.mrb[4].mxu1  ;;  %v881_v1 = vsel %vm880_vm7, %v871_v62, -1e+30  ;;  %v889_v10 = vsel %vm885_vm8, %v882_v7, -inf }
 0x3b3   : > { %v862_v2 = vpop.f32.mrb[5].mxu1  ;;  %v886_v3 = vsel %vm885_vm8, %v881_v1, -inf  ;;  %v874_v4 = vmul.f32 0.17677669, %v1664_v63 }
 0x3b4   : > { %v873_v5 = vmul.f32 0.17677669, %v862_v2  ;;  %887 = vmax.xlane.f32.xlu1 %v886_v3 }
 0x3b5   : > { %v884_v11 = vsel %vm880_vm7, %v874_v4, -1e+30 }
 0x3b6   : > { %v883_v8 = vsel %vm880_vm7, %v873_v5, -1e+30  ;;  %v895_v12 = vsel %vm885_vm8, %v884_v11, -inf }
 0x3b7   : > { %v892_v9 = vsel %vm885_vm8, %v883_v8, -inf }
 0x3b8   : > { %893 = vmax.xlane.f32.xlu0 %v892_v9  ;;  %890 = vmax.xlane.f32.xlu1 %v889_v10  ;;  %v1048_v10 = vld [vmem:[#allocation10 + $0x50] sm:$0xff] }
 0x3bc   : > { %896 = vmax.xlane.f32.xlu1 %v895_v12 }
 0x441   : > { %v888_v13 = vpop.xlane.xlu1 %887 }
 0x442   : > { %v898_v14 = vsub.f32 %v881_v1, %v888_v13  ;;  %v1050_v13 = vld [vmem:[#allocation10 + $0x60] sm:$0xff] }
 0x444   : > { %v902_v15 = vmul.f32 1.442695, %v898_v14  ;;  %v1051_v14 = vld [vmem:[#allocation10 + $0x68] sm:$0xff] }
 0x445   : > { %v894_v16 = vpop.xlane.xlu0 %893  ;;  %v891_v17 = vpop.xlane.xlu1 %890 }
 0x446   : > { %1960 = vpow2.f32 %v902_v15  ;;  %v900_v18 = vsub.f32 %v883_v8, %v894_v16  ;;  %v899_v19 = vsub.f32 %v882_v7, %v891_v17  ;;  %v1783_v15 = vpack.c.bf16 %v1051_v14, %v1050_v13  ;;  %v1052_v16 = vld [vmem:[#allocation10 + $0x70] sm:$0xff]  ;;  %v1053_v17 = vld [vmem:[#allocation10 + $0x78] sm:$0xff]  ;;  %v1176_v14 = vld [vmem:[#allocation12 + $0xc0] sm:$0xff] }
 0x448   : > { %v906_v20 = vmul.f32 1.442695, %v900_v18  ;;  %v904_v21 = vmul.f32 1.442695, %v899_v19  ;;  %v1786_v18 = vpack.c.bf16 %v1053_v17, %v1052_v16  ;;  %v1181_v17 = vld [vmem:[#allocation12 + $0xe8] sm:$0xff] }
 0x449   : > { %v897_v22 = vpop.xlane.xlu1 %896 }
 0x44a   : > { %1962 = vpow2.f32 %v906_v20  ;;  %v901_v23 = vsub.f32 %v884_v11, %v897_v22  ;;  %v1049_v11 = vld [vmem:[#allocation10 + $0x58] sm:$0xff] }
 0x44b   : > { %1964 = vpow2.f32 %v904_v21  ;;  %v1780_v12 = vpack.c.bf16 %v1049_v11, %v1048_v10  ;;  %v1177_v11 = vld [vmem:[#allocation12 + $0xc8] sm:$0xff] }
 0x44c   : > { %v908_v24 = vmul.f32 1.442695, %v901_v23 }
 0x44d   : > { %1781 = vmatpush3.bf16.msra.mxu0 %v1780_v12  ;;  %v1179_v12 = vld [vmem:[#allocation12 + $0xd8] sm:$0xff] }
 0x44e   : > { %1966 = vpow2.f32 %v908_v24  ;;  %1782 = vmatprep.subr.bf16.mxu0 %v2251_v6  ;;  %v1812_v13 = vpack.c.bf16 %v1179_v12, %v1177_v11  ;;  %v1281_v11 = vld [vmem:[#allocation13 + $0x60] sm:$0xff]  ;;  %v1282_v12 = vld [vmem:[#allocation13 + $0x68] sm:$0xff] }
 0x450   : > { %v1961_v25 = vpop.eup %1960 }
 0x451   : > { %v910_v26 = vsel %vm885_vm8, %v1961_v25, 0.0  ;;  %1784 = vmatpush3.bf16.msra.mxu0 %v1783_v15  ;;  %v1178_v15 = vld [vmem:[#allocation12 + $0xd0] sm:$0xff] }
 0x452   : > { %911 = vadd.xlane.f32.xlu0 %v910_v26  ;;  %1785 = vmatprep.subr.bf16.mxu0 %v2251_v6  ;;  %v1814_v16 = vpack.c.bf16 %v1178_v15, %v1176_v14  ;;  %v1299_v14 = vld [vmem:[#allocation13 + $0xf0] sm:$0xff]  ;;  %v1300_v15 = vld [vmem:[#allocation13 + $0xf8] sm:$0xff] }
 0x454   : > { %v1963_v27 = vpop.eup %1962 }
 0x455   : > { %v1965_v28 = vpop.eup %1964  ;;  %v916_v30 = vsel %vm885_vm8, %v1963_v27, 0.0  ;;  %1787 = vmatpush3.bf16.msra.mxu0 %v1786_v18  ;;  %v1183_v18 = vld [vmem:[#allocation12 + $0xf8] sm:$0xff] }
 0x456   : > { %917 = vadd.xlane.f32.xlu0 %v916_v30  ;;  %v913_v31 = vsel %vm885_vm8, %v1965_v28, 0.0 }
 0x457   : > { %914 = vadd.xlane.f32.xlu1 %v913_v31  ;;  %v1155_v31 = vld [vmem:[#allocation12 + $0x18] sm:$0xff] }
 0x458   : > { %v1967_v32 = vpop.eup %1966 }
 0x459   : > { %v919_v33 = vsel %vm885_vm8, %v1967_v32, 0.0 }
 0x45b   : > { %920 = vadd.xlane.f32.xlu1 %v919_v33  ;;  %v1154_v33 = vld [vmem:[#allocation12 + $0x10] sm:$0xff] }
 0x4df   : > { %v912_v54 = vpop.xlane.xlu0 %911 }
 0x4e0   : > { %1968 = vrcp.f32 %v912_v54  ;;  %v1167_v54 = vld [vmem:[#allocation12 + $0x78] sm:$0xff] }
 0x4e3   : > { %v918_v55 = vpop.xlane.xlu0 %917 }
 0x4e4   : > { %1970 = vrcp.f32 %v918_v55  ;;  %v915_v56 = vpop.xlane.xlu1 %914  ;;  %v1800_v55 = vpack.c.bf16 %v1167_v54, %v1165_v52  ;;  %v1296_v52 = vld [vmem:[#allocation13 + $0xd8] sm:$0xff] }
 0x4e5   : > { %1972 = vrcp.f32 %v915_v56  ;;  %v1164_v56 = vld [vmem:[#allocation12 + $0x60] sm:$0xff] }
 0x4e8   : > { %v921_v58 = vpop.xlane.xlu1 %920 }
 0x4e9   : > { %1974 = vrcp.f32 %v921_v58  ;;  %v1166_v58 = vld [vmem:[#allocation12 + $0x70] sm:$0xff] }
 0x4ea   : > { %v1969_v59 = vpop.eup %1968 }
 0x4eb   : > { %v926_v61 = vmul.f32 %v1969_v59, %v1961_v25  ;;  %v1802_v59 = vpack.c.bf16 %v1166_v58, %v1164_v56  ;;  %v1279_v56 = vld [vmem:[#allocation13 + $0x50] sm:$0xff]  ;;  %v1280_v58 = vld [vmem:[#allocation13 + $0x58] sm:$0xff] }
 0x4ed   : > { %v930_v62 = vmul.f32 %v926_v61, %v2654_v57  ;;  %v1169_v61 = vld [vmem:[#allocation12 + $0x88] sm:$0xff] }
 0x4ee   : > { %v1971_v63 = vpop.eup %1970 }
 0x4ef   : > { %v1973_v1 = vpop.eup %1972  ;;  %1667 = vmatprep.mubr.msk.f32.mxu1 %vm885_vm8, %v930_v62  ;;  %v928_v2 = vmul.f32 %v1971_v63, %v1963_v27  ;;  %v1171_v62 = vld [vmem:[#allocation12 + $0x98] sm:$0xff] }
 0x4f0   : > { %v927_v3 = vmul.f32 %v1973_v1, %v1965_v28  ;;  %v1804_v63 = vpack.c.bf16 %v1171_v62, %v1169_v61  ;;  %v1168_v1 = vld [vmem:[#allocation12 + $0x80] sm:$0xff]  ;;  %v1298_v61 = vld [vmem:[#allocation13 + $0xe8] sm:$0xff]  ;;  %v1842_v62 = vpack.c.bf16 %v1280_v58, %v1279_v56 }
 0x4f1   : > { %v932_v4 = vmul.f32 %v928_v2, %v2654_v57  ;;  %v1170_v2 = vld [vmem:[#allocation12 + $0x90] sm:$0xff] }
 0x4f2   : > { %v931_v5 = vmul.f32 %v927_v3, %v2654_v57  ;;  %v1806_v3 = vpack.c.bf16 %v1170_v2, %v1168_v1 }
 0x4f3   : > { %v1975_v7 = vpop.eup %1974 }
 0x4f4   : > { %1668 = vmatmul.mubr.msk.f32.vlgmr.msra.gmra.mrb[6].mxu1 %vm885_vm8, %v931_v5  ;;  %v929_v8 = vmul.f32 %v1975_v7, %v1967_v32  ;;  %v1175_v5 = vld [vmem:[#allocation12 + $0xb8] sm:$0xff] }
 0x4f5   : > { %1670 = vmatprep.mubr.msk.f32.mxu1 %vm885_vm8, %v932_v4  ;;  %v1173_v4 = vld [vmem:[#allocation12 + $0xa8] sm:$0xff] }
 0x4f6   : > { %v933_v9 = vmul.f32 %v929_v8, %v2654_v57  ;;  %v1808_v7 = vpack.c.bf16 %v1175_v5, %v1173_v4  ;;  %v1172_v8 = vld [vmem:[#allocation12 + $0xa0] sm:$0xff]  ;;  %v1536_v5 = vld [vmem:[%s2774_s7] ss:$0 sm:$0xff] }
 0x4f8   : > { %1671 = vmatmul.mubr.msk.f32.gmra.mrb[8].mxu1 %vm885_vm8, %v933_v9  ;;  %v1174_v9 = vld [vmem:[#allocation12 + $0xb0] sm:$0xff] }
 0x4f9   : > { %1260 = vmatprep.mubr.f32.mxu1 %v2252_v60  ;;  %v1810_v10 = vpack.c.bf16 %v1174_v9, %v1172_v8  ;;  %v1537_v8 = vld [vmem:[%s2812_s22] ss:$0 sm:$0xff]  ;;  %s2724_s22 = scalar_lea.hbm %s2815_s28, %s1540_s8 }
 0x5c7   : > { %v1669_v57 = vpop.f32.mrb[6].mxu1 }
 0x5c8   : > { %v1032_v19 = vmul.f32 %v1669_v57, %v2636_v45  ;;  %v1012_v60 = vpop.f32.mrb[7].mxu1  ;;  %v1153_v45 = vld [vmem:[#allocation12 + $0x8] sm:$0xff]  ;;  %v1816_v57 = vpack.c.bf16 %v1183_v18, %v1181_v17  ;;  %v1283_v17 = vld [vmem:[#allocation13 + $0x70] sm:$0xff]  ;;  %v1284_v18 = vld [vmem:[#allocation13 + $0x78] sm:$0xff] }
 0x5c9   : > { %v1031_v20 = vmul.f32 %v1012_v60, %v2639_v46  ;;  %v1152_v46 = vld [vmem:[#allocation12] sm:$0xff]  ;;  %v1788_v32 = vpack.c.bf16 %v1155_v31, %v1153_v45  ;;  %v1182_v60 = vld [vmem:[#allocation12 + $0xf0] sm:$0xff]  ;;  %v1272_v31 = vld [vmem:[#allocation13 + $0x18] sm:$0xff] }
 0x5ca   : > { %v1271_v45 = vld [vmem:[#allocation13 + $0x10] sm:$0xff] }
 0x5cb   : > { %v1035_v21 = vadd.f32 %v1032_v19, %v1031_v20  ;;  %v1672_v22 = vpop.f32.mrb[8].mxu1  ;;  %1789 = vmatprep.subr.bf16.mxu1 %v1788_v32  ;;  %v1180_v19 = vld [vmem:[#allocation12 + $0xe0] sm:$0xff]  ;;  %v1290_v32 = vld [vmem:[#allocation13 + $0xa8] sm:$0xff] }
 0x5cc   : > { %v1022_v23 = vpop.f32.mrb[9].mxu1  ;;  %v1034_v25 = vmul.f32 %v1672_v22, %v2647_v53  ;;  %v1156_v53 = vld [vmem:[#allocation12 + $0x20] sm:$0xff]  ;;  %v1818_v20 = vpack.c.bf16 %v1182_v60, %v1180_v19  ;;  %v1286_v22 = vld [vmem:[#allocation13 + $0x88] sm:$0xff]  ;;  %v1192_v19 = vsub.s32 1, %v2626_v29 }
 0x5cd   : > { %v1033_v24 = vmul.f32 %v1022_v23, %v2642_v48  ;;  %v1790_v48 = vpack.c.bf16 %v1154_v33, %v1152_v46  ;;  %v1269_v23 = vld [vmem:[#allocation13] sm:$0xff]  ;;  %v1826_v33 = vpack.c.bf16 %v1272_v31, %v1271_v45 }
 0x5ce   : > { %v1289_v46 = vld [vmem:[#allocation13 + $0xa0] sm:$0xff] }
 0x5cf   : > { %v1036_v26 = vadd.f32 %v1035_v21, %v1033_v24  ;;  %1791 = vmatpush1.bf16.msra.mxu1 %v1790_v48  ;;  %v1285_v21 = vld [vmem:[#allocation13 + $0x80] sm:$0xff]  ;;  %v1828_v34 = vpack.c.bf16 %v1290_v32, %v1289_v46  ;;  %v1274_v48 = vld [vmem:[#allocation13 + $0x28] sm:$0xff] }
 0x5d0   : > { %1793 = vmatprep.subr.bf16.mxu1 %v1792_v36  ;;  %v1820_v24 = vpack.c.bf16 %v1286_v22, %v1285_v21  ;;  %v1291_v36 = vld [vmem:[#allocation13 + $0xb0] sm:$0xff] }
 0x5d1   : > { %v1037_v27 = vadd.f32 %v1036_v26, %v1034_v25  ;;  %v1270_v25 = vld [vmem:[#allocation13 + $0x8] sm:$0xff]  ;;  %v1287_v26 = vld [vmem:[#allocation13 + $0x90] sm:$0xff] }
 0x5d2   : > { %1821 = vmatprep.subr.bf16.mxu0 %v1820_v24 }
 0x5d3   : > { %1706 = vmatmul.mubr.f32.vlgmr.msra.gmra.mrb[2].mxu0 %v1037_v27  ;;  %v1288_v27 = vld [vmem:[#allocation13 + $0x98] sm:$0xff] }
 0x6a6   : > { %v1120_v6 = vpop.f32.mrb[2].mxu0 }
 0x6a7   : > { %v2694_v28 = vadd.f32 %v1120_v6, %v2596_v0  ;;  %v1707_v30 = vpop.f32.mrb[3].mxu0  ;;  %v1794_v0 = vpack.c.bf16 %v1158_v37, %v1156_v53  ;;  %v1822_v6 = vpack.c.bf16 %v1270_v25, %v1269_v23  ;;  %v1292_v53 = vld [vmem:[#allocation13 + $0xb8] sm:$0xff]  ;;  %v1830_v37 = vpack.c.bf16 %v1274_v48, %v1273_v35 }
 0x6a8   : > { %v1824_v30 = vpack.c.bf16 %v1288_v27, %v1287_v26  ;;  %v1832_v38 = vpack.c.bf16 %v1292_v53, %v1291_v36 }
 0x6a9   : > { %1127 = vadd.xlane.f32.xlu0 %v2694_v28  ;;  %1795 = vmatpush1.bf16.msra.mxu1 %v1794_v0  ;;  %v1276_v0 = vld [vmem:[#allocation13 + $0x38] sm:$0xff] }
 0x6aa   : > { %1797 = vmatprep.subr.bf16.mxu1 %v1796_v40  ;;  %1823 = vmatpush3.bf16.msra.mxu0 %v1822_v6  ;;  %v1293_v40 = vld [vmem:[#allocation13 + $0xc0] sm:$0xff]  ;;  %v1834_v43 = vpack.c.bf16 %v1276_v0, %v1275_v39  ;;  %v1538_v6 = vld [vmem:[%s2814_s30] ss:$0 sm:$0xff] }
 0x6ab   : > { %1825 = vmatprep.subr.bf16.mxu0 %v1824_v30 }
 0x6ad   : > { %1799 = vmatpush1.bf16.msra.mxu1 %v1798_v44  ;;  %v1836_v44 = vpack.c.bf16 %v1294_v41, %v1293_v40 }
 0x6ae   : > { %1801 = vmatprep.subr.bf16.mxu1 %v1800_v55  ;;  %1827 = vmatpush3.bf16.msra.mxu0 %v1826_v33 }
 0x6af   : > { %1829 = vmatprep.subr.bf16.mxu0 %v1828_v34 }
 0x6b1   : > { %1803 = vmatpush1.bf16.msra.mxu1 %v1802_v59  ;;  %v1297_v59 = vld [vmem:[#allocation13 + $0xe0] sm:$0xff] }
 0x6b2   : > { %1805 = vmatprep.subr.bf16.mxu1 %v1804_v63  ;;  %1831 = vmatpush3.bf16.msra.mxu0 %v1830_v37  ;;  %v1844_v63 = vpack.c.bf16 %v1298_v61, %v1297_v59 }
 0x6b3   : > { %1833 = vmatprep.subr.bf16.mxu0 %v1832_v38 }
 0x6b5   : > { %1807 = vmatpush1.bf16.msra.mxu1 %v1806_v3 }
 0x6b6   : > { %1809 = vmatprep.subr.bf16.mxu1 %v1808_v7  ;;  %1835 = vmatpush3.bf16.msra.mxu0 %v1834_v43 }
 0x6b7   : > { %1837 = vmatprep.subr.bf16.mxu0 %v1836_v44 }
 0x6b9   : > { %1811 = vmatpush1.bf16.msra.mxu1 %v1810_v10 }
 0x6ba   : > { %1813 = vmatprep.subr.bf16.mxu1 %v1812_v13  ;;  %v1846_v13 = vpack.c.bf16 %v1282_v12, %v1281_v11 }
 0x6bd   : > { %1815 = vmatpush1.bf16.msra.mxu1 %v1814_v16  ;;  %v1848_v16 = vpack.c.bf16 %v1300_v15, %v1299_v14 }
 0x6be   : > { %1817 = vmatprep.subr.bf16.mxu1 %v1816_v57  ;;  %v1850_v57 = vpack.c.bf16 %v1284_v18, %v1283_v17 }
 0x6c1   : > { %1819 = vmatpush1.bf16.msra.mxu1 %v1818_v20 }
 0x736   : > { %v1128_v47 = vpop.xlane.xlu0 %1127 }
 0x737   : > { %v1129_v49 = vmul.f32 0.0078125, %v1128_v47  ;;  %v1277_v47 = vld [vmem:[#allocation13 + $0x40] sm:$0xff] }
 0x739   : > { %v2698_v50 = vsub.f32 %v2694_v28, %v1129_v49  ;;  %v1278_v49 = vld [vmem:[#allocation13 + $0x48] sm:$0xff] }
 0x73a   : > { %v1838_v54 = vpack.c.bf16 %v1278_v49, %v1277_v47 }
 0x73b   : > { %v1131_v51 = vmul.f32 %v2698_v50, %v2698_v50 }
 0x73c   : > { %1839 = vmatpush3.bf16.msra.mxu0 %v1838_v54 }
 0x73d   : > { %1132 = vadd.xlane.f32.xlu1 %v1131_v51  ;;  %v1295_v51 = vld [vmem:[#allocation13 + $0xd0] sm:$0xff] }
 0x73e   : > { %v1840_v55 = vpack.c.bf16 %v1296_v52, %v1295_v51 }
 0x740   : > { %1841 = vmatprep.subr.bf16.mxu0 %v1840_v55 }
 0x741   : > { %1843 = vmatpush3.bf16.msra.mxu0 %v1842_v62 }
 0x742   : > { %1845 = vmatprep.subr.bf16.mxu0 %v1844_v63 }
 0x745   : > { %1847 = vmatpush3.bf16.msra.mxu0 %v1846_v13 }
 0x746   : > { %1849 = vmatprep.subr.bf16.mxu0 %v1848_v16 }
 0x749   : > { %1851 = vmatpush3.bf16.msra.mxu0 %v1850_v57 }
 0x7ca   : > { %v1133_v1 = vpop.xlane.xlu1 %1132 }
 0x7cb   : > { %v1134_v2 = vmul.f32 0.0078125, %v1133_v1 }
 0x7cd   : > { %v1135_v3 = vadd.f32 1e-05, %v1134_v2 }
 0x7cf   : > { %1976 = vrsqrt.f32 %v1135_v3 }
 0x7d9   : > { %v1977_v4 = vpop.eup %1976 }
 0x7da   : > { %v1137_v7 = vmul.f32 %v1977_v4, %v2698_v50  ;;  %v1184_v50 = vld [vmem:[%s2813_s13] sm:$0x3]  ;;  %s2164_s13 = scalar_lea.vmem %s2163_s14, 256 }
 0x7db   : > { %v1189_v60 = vrot.slane %v1184_v50, %v2633_v42  ;;  %v1193_v20 = vrot.slane %v1184_v50, %v1192_v19  ;;  %p2166_p6 = scmp.lt.s32.totalorder %s2164_s13, %s2158_s12 }
 0x7dc   : > { %v1144_v9 = vmul.f32 %v1536_v5, %v1137_v7 }
 0x7dd   : > { %p2167_p5 = por %p2166_p6, %p2165_p4 }
 0x7de   : > { %v1151_v10 = vadd.f32 %v1537_v8, %v1144_v9 }
 0x7df   : > { %p2168_p3 = pnand %p2167_p5, %p2161_p2 }
 0x7e0   : > { %1261 = vmatmul.mubr.f32.vlgmr.msra.gmra.mrb[10].mxu1 %v1151_v10 }
 0x8b3   : > { %v1262_v21 = vpop.f32.mrb[10].mxu1 }
 0x8b4   : > { %v1263_v22 = vadd.f32 %v1262_v21, %v1189_v60  ;;  %v1264_v23 = vpop.f32.mrb[11].mxu1 }
 0x8b5   : > { %v1265_v24 = vadd.f32 %v1264_v23, %v1193_v20 }
 0x8b6   : > { %v1267_v26 = vmax.f32 %v1263_v22, 0.0 }
 0x8b7   : > { %v1268_v25 = vmax.f32 %v1265_v24, 0.0 }
 0x8b9   : > { %1372 = vmatprep.mubr.f32.mxu0 %v1268_v25 }
 0x8ba   : > { %1373 = vmatmul.mubr.f32.vlgmr.msra.gmra.mrb[4].mxu0 %v1267_v26 }
 0x98d   : > { %v1619_v27 = vpop.f32.mrb[4].mxu0 }
 0x98e   : > { %v1620_v29 = vpop.f32.mrb[5].mxu0 }
 0x98f   : > { %v1621_v30 = vadd.f32 %v1620_v29, %v1619_v27 }
 0x991   : > { %v1375_v42 = vadd.f32 %v1621_v30, %v1538_v6 }
 0x993   : > { %v1378_v45 = vadd.f32 %v1375_v42, %v2694_v28 }
 0x995   : > { %1379 = vst [vmem:[%s506_s16] sm:$0xff] %v1378_v45 }
 0x996   : > { %2171 = shalt.err (!%p2168_p3)
}
 0x997   : > { %s2172_s27 = scalar_lea.hbm %s2724_s22, 128  ;;  %s2176_s30 = scalar_lea.hbm %s2815_s28, 384 }
 0x998   : > { %p2173_p8 = scmp.ne.s32.totalorder %s2724_s22, %s2172_s27  ;;  %p2177_p10 = scmp.lt.u32.totalorder %s2724_s22, %s2815_s28 }
 0x999   : > { %p2178_p7 = scmp.lt.u32.totalorder %s2176_s30, %s2172_s27  ;;  %p2180_p9 = scmp.lt.u32.totalorder %s2172_s27, %s2724_s22 }
 0x99a   : > { %p2174_p13 = pnand %p2173_p8, %p2816_p12 }
 0x99b   : > { %p2179_p11 = por %p2178_p7, %p2177_p10 }
 0x99c   : > { %p2175_p0 = pneg %p2174_p13 }
 0x99d   : > { %p2181_p1 = por %p2180_p9, %p2179_p11 }
 0x99f   : > { %p2182_p2 = pnand %p2181_p1, %p2175_p0 }
 0x9a1   : > { %2185 = shalt.err (!%p2182_p2)
}
 0x9a2   : > { %1874 = dma.vmem_to_hbm [thread:$0]  (%p2816_p12), %s2726_s26, 128, %s2724_s22, %s1381_s29  }
 0x9a3 PF: > { %p1911_p4 = scmp.ge.s32.totalorder %s2238_s21, 2  ;;  %s1406_s17 = sand.u32 1, %s2226_s18  }
 0x9a4   : > { %p2817_p6 = scmp.ne.s32.totalorder %s2803_s10, 0  ;;  %s1407_s6 = scalar_lea.sflag [#allocation6], %s1406_s17 }
 0x9a6   : > { %p1897_p5 = pnand %p1911_p4, %p2817_p6 }
 0x9a8   : > { %2221 = dma.done.wait (!%p1897_p5), %s1407_s6, 128  }
 0x9a9   : > { %2223 = vsyncadd (!%p1897_p5), %s1407_s6, 4294967168  ;;  %p33_p3 = scmp.ge.s32.totalorder %s2504_s0, 5   ;;  %s2818_s18 = smov %s2230_s19 }
 0x9aa   : > { %s2819_s19 = smov %s2234_s20  ;;  %s2820_s20 = smov %s2516_s15 }
 0x9ab   : > { %s2821_s21 = smov %s2504_s0  ;;  %35 = sbr.rel (!%p33_p3) target bundleno = 21 (0x15), region = 133 }
 0x9b2   :  { %1412 = vsyncpa [#allocation5], 1 }
 0x9b3   :  { %1414 = vsyncpa [#allocation5 + $0x1], 1 }
 0x9b4   :  { %1415 = vsyncpa [#allocation8], 1 }
 0x9b5   :  { %1416 = vsyncpa [#allocation11], 1 }
 0x9b6   :  { %1417 = vsyncpa [#allocation14], 1 }
 0x9b7   :  { %1418 = vsyncpa [#allocation6], 1 }
 0x9b8   :  { %1420 = vsyncpa [#allocation6 + $0x1], 1 }

</bundles_post_ra>
